<compile_context>
chip_gen: v5e
topology: v5e:2x2
jax: 0.10.0
libtpu: 0.0.40
codegen_flags: <defaults>
</compile_context>

<pallas_src>
import math
import functools

import jax
import jax.numpy as jnp
from jax.experimental import pallas as pl
from jax.experimental.pallas import tpu as pltpu


# ----------------------------- kernel ---------------------------------------


def _layernorm(x, gamma, beta, eps=1e-5):
    mu = jnp.mean(x, axis=-1, keepdims=True)
    var = jnp.mean((x - mu) ** 2, axis=-1, keepdims=True)
    return (x - mu) * jax.lax.rsqrt(var + eps) * gamma + beta


def encoder_kernel(
    x_ref,                      # (N*T, E)  encoder input (fetched once: constant index map)
    wqT_ref, wkT_ref, wvT_ref,  # (D, D)    per-layer projections (shared across heads), transposed
    woT_ref, bo_ref,            # (E, E), (1, E)   fc_out
    g1_ref, be1_ref,            # (1, E)    norm1
    w1T_ref, bf1_ref,           # (E, FE), (1, FE) FFN linear 1
    w2T_ref, bf2_ref,           # (FE, E), (1, E)  FFN linear 2
    g2_ref, be2_ref,            # (1, E)    norm2
    g3_ref, be3_ref,            # (1, E)    block norm
    out_ref,                    # (N*T, E)
    act_ref,                    # VMEM scratch (N*T, E) f32 — resident activation carry
    *,
    N: int,
    T: int,
    heads: int,
    head_dim: int,
):
    layer = pl.program_id(0)
    E = heads * head_dim
    NT = N * T

    # Initialize the resident activation from the encoder input at layer 0.
    @pl.when(layer == 0)
    def _():
        act_ref[...] = x_ref[...].astype(jnp.float32)

    x = act_ref[...]                                   # (NT, E) f32
    scale = 1.0 / math.sqrt(float(E))

    wqT = wqT_ref[...]
    wkT = wkT_ref[...]
    wvT = wvT_ref[...]
    woT = woT_ref[...]

    # --- multi-head attention ---------------------------------------------
    # Static loop over heads (tiny); batch handled by batched einsums.
    partial_out = []
    for h in range(heads):
        lo = h * head_dim
        xh = x[:, lo:lo + head_dim]                    # (NT, D) head slice of the input
        qh = jnp.dot(xh, wqT, preferred_element_type=jnp.float32).reshape(N, T, head_dim)
        kh = jnp.dot(xh, wkT, preferred_element_type=jnp.float32).reshape(N, T, head_dim)
        vh = jnp.dot(xh, wvT, preferred_element_type=jnp.float32).reshape(N, T, head_dim)

        s = jnp.einsum("nqd,nkd->nqk", qh, kh,
                       preferred_element_type=jnp.float32) * scale    # (N, T, T)
        s = s - jnp.max(s, axis=-1, keepdims=True)
        p = jnp.exp(s)
        p = p * pl.reciprocal(jnp.sum(p, axis=-1, keepdims=True), approx=True)
        oh = jnp.einsum("nqk,nkd->nqd", p, vh,
                        preferred_element_type=jnp.float32)           # (N, T, D)

        # Fold fc_out per head:  attn @ WoT == sum_h o_h @ WoT[h*D:(h+1)*D, :]
        # (avoids concatenating head outputs along lanes).
        partial_out.append(
            jnp.dot(oh.reshape(NT, head_dim), woT[lo:lo + head_dim, :],
                    preferred_element_type=jnp.float32))

    attn = partial_out[0]
    for po in partial_out[1:]:
        attn = attn + po
    attn = attn + bo_ref[...]                          # (NT, E)

    # --- TTransformer: x1 = norm1(attention + query) ------------------------
    x1 = _layernorm(attn + x, g1_ref[...], be1_ref[...])

    # --- feed forward --------------------------------------------------------
    h1 = jnp.maximum(
        jnp.dot(x1, w1T_ref[...], preferred_element_type=jnp.float32) + bf1_ref[...],
        0.0)
    ff = jnp.dot(h1, w2T_ref[...], preferred_element_type=jnp.float32) + bf2_ref[...]

    # --- x2 = norm2(forward + x1) --------------------------------------------
    x2 = _layernorm(ff + x1, g2_ref[...], be2_ref[...])

    # --- STTransformerBlock: norm(TT(out) + query) ----------------------------
    x3 = _layernorm(x2 + x, g3_ref[...], be3_ref[...])

    act_ref[...] = x3                                  # carry to the next layer

    @pl.when(layer == pl.num_programs(0) - 1)
    def _():
        out_ref[...] = x3.astype(out_ref.dtype)


# ----------------------------- wrapper ---------------------------------------


def encoder_pallas(x, layer_params, heads):
    """Apply the full Encoder (all layers) in a single fused pallas_call.

    x: (N, T, E) float32.  layer_params: list of per-layer parameter dicts.
    """
    N, T, E = x.shape
    L = len(layer_params)
    D = E // heads
    FE = layer_params[0]["w1T"].shape[1]

    # Stack per-layer params on a leading layer axis so the grid streams them.
    stacked = {k: jnp.stack([p[k] for p in layer_params], axis=0)
               for k in layer_params[0]}

    x2d = x.reshape(N * T, E)

    def per_layer(*shape):
        zeros = (0,) * len(shape)
        return pl.BlockSpec((None,) + tuple(shape),
                            lambda l, zeros=zeros: (l,) + zeros)

    kernel = functools.partial(encoder_kernel, N=N, T=T, heads=heads, head_dim=D)

    out2d = pl.pallas_call(
        kernel,
        out_shape=jax.ShapeDtypeStruct((N * T, E), x.dtype),
        grid_spec=pltpu.PrefetchScalarGridSpec(
            num_scalar_prefetch=0,
            grid=(L,),
            in_specs=[
                pl.BlockSpec((N * T, E), lambda l: (0, 0)),   # x (loaded once)
                per_layer(D, D),                               # wqT
                per_layer(D, D),                               # wkT
                per_layer(D, D),                               # wvT
                per_layer(E, E),                               # woT
                per_layer(1, E),                               # bo
                per_layer(1, E), per_layer(1, E),              # norm1 gamma/beta
                per_layer(E, FE),                              # w1T
                per_layer(1, FE),                              # bf1
                per_layer(FE, E),                              # w2T
                per_layer(1, E),                               # bf2
                per_layer(1, E), per_layer(1, E),              # norm2 gamma/beta
                per_layer(1, E), per_layer(1, E),              # block norm gamma/beta
            ],
            out_specs=pl.BlockSpec((N * T, E), lambda l: (0, 0)),   # resident output
            scratch_shapes=[pltpu.VMEM((N * T, E), jnp.float32)],
        ),
        compiler_params=pltpu.CompilerParams(dimension_semantics=("arbitrary",)),
    )(
        x2d,
        stacked["wqT"], stacked["wkT"], stacked["wvT"],
        stacked["woT"], stacked["bo"],
        stacked["g1"], stacked["be1"],
        stacked["w1T"], stacked["bf1"], stacked["w2T"], stacked["bf2"],
        stacked["g2"], stacked["be2"],
        stacked["g3"], stacked["be3"],
    )
    return out2d.reshape(N, T, E)


# ------------------------- parameter initialization ---------------------------


def init_layer_params(key, embed_size, heads, forward_expansion):
    D = embed_size // heads
    FE = forward_expansion * embed_size
    ks = jax.random.split(key, 8)

    def lin(k, out_f, in_f):
        # PyTorch Linear weight is (out, in).
        bound = 1.0 / math.sqrt(in_f)
        return jax.random.uniform(k, (out_f, in_f), jnp.float32, -bound, bound)

    wv = lin(ks[0], D, D)        # shared across heads, as in nn.Linear(head_dim, head_dim)
    wk = lin(ks[1], D, D)
    wq = lin(ks[2], D, D)
    wo = lin(ks[3], embed_size, embed_size)
    bo = jax.random.uniform(ks[4], (embed_size,), jnp.float32, -0.1, 0.1)
    w1 = lin(ks[5], FE, embed_size)
    bf1 = jax.random.uniform(ks[6], (FE,), jnp.float32, -0.1, 0.1)
    w2 = lin(ks[7], embed_size, FE)
    bf2 = jnp.zeros((embed_size,), jnp.float32)

    return {
        # pre-transposed so the kernel computes x @ W
        "wqT": wq.T, "wkT": wk.T, "wvT": wv.T,
        "woT": wo.T,
        "bo": bo.reshape(1, embed_size),
        "g1": jnp.ones((1, embed_size), jnp.float32),
        "be1": jnp.zeros((1, embed_size), jnp.float32),
        "w1T": w1.T,
        "bf1": bf1.reshape(1, FE),
        "w2T": w2.T,
        "bf2": bf2.reshape(1, embed_size),
        "g2": jnp.ones((1, embed_size), jnp.float32),
        "be2": jnp.zeros((1, embed_size), jnp.float32),
        "g3": jnp.ones((1, embed_size), jnp.float32),
        "be3": jnp.zeros((1, embed_size), jnp.float32),
    }


# ----------------------------- pure-JAX reference -----------------------------


def _ref_ln(x, g, b, eps=1e-5):
    mu = jnp.mean(x, axis=-1, keepdims=True)
    var = jnp.mean((x - mu) ** 2, axis=-1, keepdims=True)
    return (x - mu) / jnp.sqrt(var + eps) * g + b


def ref_layer(x, p, heads):
    N, T, E = x.shape
    D = E // heads
    xh = x.reshape(N, T, heads, D)
    V = xh @ p["wvT"]
    K = xh @ p["wkT"]
    Q = xh @ p["wqT"]
    energy = jnp.einsum("nqhd,nkhd->nqkh", Q, K)
    attn = jax.nn.softmax(energy / math.sqrt(E), axis=2)
    out = jnp.einsum("nqkh,nkhd->nqhd", attn, V).reshape(N, T, E)
    out = out @ p["woT"] + p["bo"]
    x1 = _ref_ln(out + x, p["g1"], p["be1"])
    ff = jnp.maximum(x1 @ p["w1T"] + p["bf1"], 0.0) @ p["w2T"] + p["bf2"]
    x2 = _ref_ln(ff + x1, p["g2"], p["be2"])
    return _ref_ln(x2 + x, p["g3"], p["be3"])


def ref_encoder(x, layer_params, heads):
    out = x  # Encoder.forward: dropout(x) == identity in eval mode
    for p in layer_params:
        out = ref_layer(out, p, heads)
    return out


# ----------------------------------- main -------------------------------------

if __name__ == "__main__":
    embed_size = 32
    heads = 4
    num_layers = 2
    forward_expansion = 4
    N, T = 2, 8

    key = jax.random.PRNGKey(0)
    kx, *kl = jax.random.split(key, 1 + num_layers)
    x = jax.random.normal(kx, (N, T, embed_size), jnp.float32)
    layer_params = [
        init_layer_params(kl[i], embed_size, heads, forward_expansion)
        for i in range(num_layers)
    ]

    out = jax.block_until_ready(encoder_pallas(x, layer_params, heads))
    ref = jax.block_until_ready(ref_encoder(x, layer_params, heads))

    assert out.shape == (N, T, embed_size)
    # Tolerance slightly loosened from 1e-4 because the softmax denominator uses
    # the approximate EUP reciprocal (pl.reciprocal(..., approx=True)).
    max_err = float(jnp.max(jnp.abs(out - ref)))
    assert max_err < 1e-3, f"mismatch vs JAX reference, max_err={max_err}"

    print("KERNEL_OK")
</pallas_src>

<mosaic_0001>
module attributes {stable_mosaic.version = 11 : i64} {
  func.func @encoder_kernel(%arg0: i32, %arg1: memref<16x32xf32, #tpu.memory_space<vmem>>, %arg2: memref<1x8x8xf32, #tpu.memory_space<vmem>>, %arg3: memref<1x8x8xf32, #tpu.memory_space<vmem>>, %arg4: memref<1x8x8xf32, #tpu.memory_space<vmem>>, %arg5: memref<1x32x32xf32, #tpu.memory_space<vmem>>, %arg6: memref<1x1x32xf32, #tpu.memory_space<vmem>>, %arg7: memref<1x1x32xf32, #tpu.memory_space<vmem>>, %arg8: memref<1x1x32xf32, #tpu.memory_space<vmem>>, %arg9: memref<1x32x128xf32, #tpu.memory_space<vmem>>, %arg10: memref<1x1x128xf32, #tpu.memory_space<vmem>>, %arg11: memref<1x128x32xf32, #tpu.memory_space<vmem>>, %arg12: memref<1x1x32xf32, #tpu.memory_space<vmem>>, %arg13: memref<1x1x32xf32, #tpu.memory_space<vmem>>, %arg14: memref<1x1x32xf32, #tpu.memory_space<vmem>>, %arg15: memref<1x1x32xf32, #tpu.memory_space<vmem>>, %arg16: memref<1x1x32xf32, #tpu.memory_space<vmem>>, %arg17: memref<16x32xf32, #tpu.memory_space<vmem>>, %arg18: memref<16x32xf32, #tpu.memory_space<vmem>>) attributes {dimension_semantics = [#tpu.dimension_semantics<arbitrary>], iteration_bounds = array<i64: 2>, scalar_prefetch = 0 : i64, scratch_operands = 1 : i64, tpu.core_type = #tpu.core_type<tc>, window_params = [{pipeline_mode = #tpu.pipeline_mode<synchronous>, transform_indices = @transform_0, window_bounds = array<i64: 16, 32>}, {transform_indices = @transform_1, window_bounds = array<i64: 1, 8, 8>}, {transform_indices = @transform_2, window_bounds = array<i64: 1, 8, 8>}, {transform_indices = @transform_3, window_bounds = array<i64: 1, 8, 8>}, {transform_indices = @transform_4, window_bounds = array<i64: 1, 32, 32>}, {transform_indices = @transform_5, window_bounds = array<i64: 1, 1, 32>}, {transform_indices = @transform_6, window_bounds = array<i64: 1, 1, 32>}, {transform_indices = @transform_7, window_bounds = array<i64: 1, 1, 32>}, {transform_indices = @transform_8, window_bounds = array<i64: 1, 32, 128>}, {transform_indices = @transform_9, window_bounds = array<i64: 1, 1, 128>}, {transform_indices = @transform_10, window_bounds = array<i64: 1, 128, 32>}, {transform_indices = @transform_11, window_bounds = array<i64: 1, 1, 32>}, {transform_indices = @transform_12, window_bounds = array<i64: 1, 1, 32>}, {transform_indices = @transform_13, window_bounds = array<i64: 1, 1, 32>}, {transform_indices = @transform_14, window_bounds = array<i64: 1, 1, 32>}, {transform_indices = @transform_15, window_bounds = array<i64: 1, 1, 32>}, {pipeline_mode = #tpu.pipeline_mode<synchronous>, transform_indices = @transform_16, window_bounds = array<i64: 16, 32>}]} {
    %c0_i32 = arith.constant 0 : i32
    %0 = arith.cmpi eq, %arg0, %c0_i32 : i32
    %1 = arith.extui %0 : i1 to i32
    %c0_i32_0 = arith.constant 0 : i32
    %2 = arith.cmpi ne, %1, %c0_i32_0 : i32
    scf.if %2 {
      %c0_103 = arith.constant 0 : index
      %c0_104 = arith.constant 0 : index
      %216 = vector.load %arg1[%c0_103, %c0_104] : memref<16x32xf32, #tpu.memory_space<vmem>>, vector<16x32xf32>
      %c0_105 = arith.constant 0 : index
      %c0_106 = arith.constant 0 : index
      %217 = vector.load %arg18[%c0_105, %c0_106] : memref<16x32xf32, #tpu.memory_space<vmem>>, vector<16x32xf32>
      tpu.vector_store %arg18[%c0_105, %c0_106], %216 {strides = array<i32>} : memref<16x32xf32, #tpu.memory_space<vmem>>, vector<16x32xf32>,
    } else {
    }
    %c0 = arith.constant 0 : index
    %c0_1 = arith.constant 0 : index
    %3 = vector.load %arg18[%c0, %c0_1] : memref<16x32xf32, #tpu.memory_space<vmem>>, vector<16x32xf32>
    %c0_2 = arith.constant 0 : index
    %c0_3 = arith.constant 0 : index
    %c0_4 = arith.constant 0 : index
    %4 = vector.load %arg2[%c0_2, %c0_3, %c0_4] : memref<1x8x8xf32, #tpu.memory_space<vmem>>, vector<1x8x8xf32>
    %5 = vector.shape_cast %4 : vector<1x8x8xf32> to vector<8x8xf32>
    %c0_5 = arith.constant 0 : index
    %c0_6 = arith.constant 0 : index
    %c0_7 = arith.constant 0 : index
    %6 = vector.load %arg3[%c0_5, %c0_6, %c0_7] : memref<1x8x8xf32, #tpu.memory_space<vmem>>, vector<1x8x8xf32>
    %7 = vector.shape_cast %6 : vector<1x8x8xf32> to vector<8x8xf32>
    %c0_8 = arith.constant 0 : index
    %c0_9 = arith.constant 0 : index
    %c0_10 = arith.constant 0 : index
    %8 = vector.load %arg4[%c0_8, %c0_9, %c0_10] : memref<1x8x8xf32, #tpu.memory_space<vmem>>, vector<1x8x8xf32>
    %9 = vector.shape_cast %8 : vector<1x8x8xf32> to vector<8x8xf32>
    %c0_11 = arith.constant 0 : index
    %c0_12 = arith.constant 0 : index
    %c0_13 = arith.constant 0 : index
    %10 = vector.load %arg5[%c0_11, %c0_12, %c0_13] : memref<1x32x32xf32, #tpu.memory_space<vmem>>, vector<1x32x32xf32>
    %11 = vector.shape_cast %10 : vector<1x32x32xf32> to vector<32x32xf32>
    %12 = vector.extract_strided_slice %3 {offsets = [0, 0], sizes = [16, 8], strides = [1, 1]} : vector<16x32xf32> to vector<16x8xf32>
    %cst = arith.constant dense<0.000000e+00> : vector<16x8xf32>
    %13 = tpu.matmul %12, %5, %cst {dimension_numbers = #tpu.dot_dimension_numbers<[1], [0], [0], [1], [0, 0, 1, 1], [], []>} : vector<16x8xf32>, vector<8x8xf32>, vector<16x8xf32> -> vector<16x8xf32>
    %14 = vector.shape_cast %13 : vector<16x8xf32> to vector<2x8x8xf32>
    %cst_14 = arith.constant dense<0.000000e+00> : vector<16x8xf32>
    %15 = tpu.matmul %12, %7, %cst_14 {dimension_numbers = #tpu.dot_dimension_numbers<[1], [0], [0], [1], [0, 0, 1, 1], [], []>} : vector<16x8xf32>, vector<8x8xf32>, vector<16x8xf32> -> vector<16x8xf32>
    %16 = vector.shape_cast %15 : vector<16x8xf32> to vector<2x8x8xf32>
    %cst_15 = arith.constant dense<0.000000e+00> : vector<16x8xf32>
    %17 = tpu.matmul %12, %9, %cst_15 {dimension_numbers = #tpu.dot_dimension_numbers<[1], [0], [0], [1], [0, 0, 1, 1], [], []>} : vector<16x8xf32>, vector<8x8xf32>, vector<16x8xf32> -> vector<16x8xf32>
    %18 = vector.shape_cast %17 : vector<16x8xf32> to vector<2x8x8xf32>
    "tpu.trace_start"() <{level = 10 : i32, message = "nqd,nkd->nqk"}> : () -> ()
    %cst_16 = arith.constant dense<0.000000e+00> : vector<2x8x8xf32>
    %19 = tpu.matmul %14, %16, %cst_16 {dimension_numbers = #tpu.dot_dimension_numbers<[2], [2], [1], [1], [0, 0, 0, 1, 1, 1], [0], [0]>} : vector<2x8x8xf32>, vector<2x8x8xf32>, vector<2x8x8xf32> -> vector<2x8x8xf32>
    "tpu.trace_stop"() : () -> ()
    %cst_17 = arith.constant 0.176776692 : f32
    %20 = vector.broadcast %cst_17 : f32 to vector<2x8x8xf32>
    %21 = arith.mulf %19, %20 : vector<2x8x8xf32>
    %cst_18 = arith.constant dense<0xFF800000> : vector<2x8xf32>
    %22 = vector.multi_reduction <maximumf>, %21, %cst_18 [2] : vector<2x8x8xf32> to vector<2x8xf32>
    %23 = vector.shape_cast %22 : vector<2x8xf32> to vector<2x8x1xf32>
    %24 = vector.broadcast %23 : vector<2x8x1xf32> to vector<2x8x8xf32>
    %25 = arith.subf %21, %24 : vector<2x8x8xf32>
    %26 = math.exp %25 : vector<2x8x8xf32>
    %cst_19 = arith.constant dense<0.000000e+00> : vector<2x8xf32>
    %27 = vector.multi_reduction <add>, %26, %cst_19 [2] : vector<2x8x8xf32> to vector<2x8xf32>
    %28 = vector.shape_cast %27 : vector<2x8xf32> to vector<2x8x1xf32>
    %29 = tpu.reciprocal %28 {approx = true} : vector<2x8x1xf32> -> vector<2x8x1xf32>
    %30 = vector.broadcast %29 : vector<2x8x1xf32> to vector<2x8x8xf32>
    %31 = arith.mulf %26, %30 : vector<2x8x8xf32>
    "tpu.trace_start"() <{level = 10 : i32, message = "nqk,nkd->nqd"}> : () -> ()
    %cst_20 = arith.constant dense<0.000000e+00> : vector<2x8x8xf32>
    %32 = tpu.matmul %31, %18, %cst_20 {dimension_numbers = #tpu.dot_dimension_numbers<[2], [1], [1], [2], [0, 0, 0, 1, 1, 2], [0], [0]>} : vector<2x8x8xf32>, vector<2x8x8xf32>, vector<2x8x8xf32> -> vector<2x8x8xf32>
    "tpu.trace_stop"() : () -> ()
    %33 = vector.shape_cast %32 : vector<2x8x8xf32> to vector<16x8xf32>
    %34 = vector.extract_strided_slice %11 {offsets = [0, 0], sizes = [8, 32], strides = [1, 1]} : vector<32x32xf32> to vector<8x32xf32>
    %cst_21 = arith.constant dense<0.000000e+00> : vector<16x32xf32>
    %35 = tpu.matmul %33, %34, %cst_21 {dimension_numbers = #tpu.dot_dimension_numbers<[1], [0], [0], [1], [0, 0, 1, 1], [], []>} : vector<16x8xf32>, vector<8x32xf32>, vector<16x32xf32> -> vector<16x32xf32>
    %36 = vector.extract_strided_slice %3 {offsets = [0, 8], sizes = [16, 8], strides = [1, 1]} : vector<16x32xf32> to vector<16x8xf32>
    %cst_22 = arith.constant dense<0.000000e+00> : vector<16x8xf32>
    %37 = tpu.matmul %36, %5, %cst_22 {dimension_numbers = #tpu.dot_dimension_numbers<[1], [0], [0], [1], [0, 0, 1, 1], [], []>} : vector<16x8xf32>, vector<8x8xf32>, vector<16x8xf32> -> vector<16x8xf32>
    %38 = vector.shape_cast %37 : vector<16x8xf32> to vector<2x8x8xf32>
    %cst_23 = arith.constant dense<0.000000e+00> : vector<16x8xf32>
    %39 = tpu.matmul %36, %7, %cst_23 {dimension_numbers = #tpu.dot_dimension_numbers<[1], [0], [0], [1], [0, 0, 1, 1], [], []>} : vector<16x8xf32>, vector<8x8xf32>, vector<16x8xf32> -> vector<16x8xf32>
    %40 = vector.shape_cast %39 : vector<16x8xf32> to vector<2x8x8xf32>
    %cst_24 = arith.constant dense<0.000000e+00> : vector<16x8xf32>
    %41 = tpu.matmul %36, %9, %cst_24 {dimension_numbers = #tpu.dot_dimension_numbers<[1], [0], [0], [1], [0, 0, 1, 1], [], []>} : vector<16x8xf32>, vector<8x8xf32>, vector<16x8xf32> -> vector<16x8xf32>
    %42 = vector.shape_cast %41 : vector<16x8xf32> to vector<2x8x8xf32>
    "tpu.trace_start"() <{level = 10 : i32, message = "nqd,nkd->nqk"}> : () -> ()
    %cst_25 = arith.constant dense<0.000000e+00> : vector<2x8x8xf32>
    %43 = tpu.matmul %38, %40, %cst_25 {dimension_numbers = #tpu.dot_dimension_numbers<[2], [2], [1], [1], [0, 0, 0, 1, 1, 1], [0], [0]>} : vector<2x8x8xf32>, vector<2x8x8xf32>, vector<2x8x8xf32> -> vector<2x8x8xf32>
    "tpu.trace_stop"() : () -> ()
    %cst_26 = arith.constant 0.176776692 : f32
    %44 = vector.broadcast %cst_26 : f32 to vector<2x8x8xf32>
    %45 = arith.mulf %43, %44 : vector<2x8x8xf32>
    %cst_27 = arith.constant dense<0xFF800000> : vector<2x8xf32>
    %46 = vector.multi_reduction <maximumf>, %45, %cst_27 [2] : vector<2x8x8xf32> to vector<2x8xf32>
    %47 = vector.shape_cast %46 : vector<2x8xf32> to vector<2x8x1xf32>
    %48 = vector.broadcast %47 : vector<2x8x1xf32> to vector<2x8x8xf32>
    %49 = arith.subf %45, %48 : vector<2x8x8xf32>
    %50 = math.exp %49 : vector<2x8x8xf32>
    %cst_28 = arith.constant dense<0.000000e+00> : vector<2x8xf32>
    %51 = vector.multi_reduction <add>, %50, %cst_28 [2] : vector<2x8x8xf32> to vector<2x8xf32>
    %52 = vector.shape_cast %51 : vector<2x8xf32> to vector<2x8x1xf32>
    %53 = tpu.reciprocal %52 {approx = true} : vector<2x8x1xf32> -> vector<2x8x1xf32>
    %54 = vector.broadcast %53 : vector<2x8x1xf32> to vector<2x8x8xf32>
    %55 = arith.mulf %50, %54 : vector<2x8x8xf32>
    "tpu.trace_start"() <{level = 10 : i32, message = "nqk,nkd->nqd"}> : () -> ()
    %cst_29 = arith.constant dense<0.000000e+00> : vector<2x8x8xf32>
    %56 = tpu.matmul %55, %42, %cst_29 {dimension_numbers = #tpu.dot_dimension_numbers<[2], [1], [1], [2], [0, 0, 0, 1, 1, 2], [0], [0]>} : vector<2x8x8xf32>, vector<2x8x8xf32>, vector<2x8x8xf32> -> vector<2x8x8xf32>
    "tpu.trace_stop"() : () -> ()
    %57 = vector.shape_cast %56 : vector<2x8x8xf32> to vector<16x8xf32>
    %58 = vector.extract_strided_slice %11 {offsets = [8, 0], sizes = [8, 32], strides = [1, 1]} : vector<32x32xf32> to vector<8x32xf32>
    %cst_30 = arith.constant dense<0.000000e+00> : vector<16x32xf32>
    %59 = tpu.matmul %57, %58, %cst_30 {dimension_numbers = #tpu.dot_dimension_numbers<[1], [0], [0], [1], [0, 0, 1, 1], [], []>} : vector<16x8xf32>, vector<8x32xf32>, vector<16x32xf32> -> vector<16x32xf32>
    %60 = vector.extract_strided_slice %3 {offsets = [0, 16], sizes = [16, 8], strides = [1, 1]} : vector<16x32xf32> to vector<16x8xf32>
    %cst_31 = arith.constant dense<0.000000e+00> : vector<16x8xf32>
    %61 = tpu.matmul %60, %5, %cst_31 {dimension_numbers = #tpu.dot_dimension_numbers<[1], [0], [0], [1], [0, 0, 1, 1], [], []>} : vector<16x8xf32>, vector<8x8xf32>, vector<16x8xf32> -> vector<16x8xf32>
    %62 = vector.shape_cast %61 : vector<16x8xf32> to vector<2x8x8xf32>
    %cst_32 = arith.constant dense<0.000000e+00> : vector<16x8xf32>
    %63 = tpu.matmul %60, %7, %cst_32 {dimension_numbers = #tpu.dot_dimension_numbers<[1], [0], [0], [1], [0, 0, 1, 1], [], []>} : vector<16x8xf32>, vector<8x8xf32>, vector<16x8xf32> -> vector<16x8xf32>
    %64 = vector.shape_cast %63 : vector<16x8xf32> to vector<2x8x8xf32>
    %cst_33 = arith.constant dense<0.000000e+00> : vector<16x8xf32>
    %65 = tpu.matmul %60, %9, %cst_33 {dimension_numbers = #tpu.dot_dimension_numbers<[1], [0], [0], [1], [0, 0, 1, 1], [], []>} : vector<16x8xf32>, vector<8x8xf32>, vector<16x8xf32> -> vector<16x8xf32>
    %66 = vector.shape_cast %65 : vector<16x8xf32> to vector<2x8x8xf32>
    "tpu.trace_start"() <{level = 10 : i32, message = "nqd,nkd->nqk"}> : () -> ()
    %cst_34 = arith.constant dense<0.000000e+00> : vector<2x8x8xf32>
    %67 = tpu.matmul %62, %64, %cst_34 {dimension_numbers = #tpu.dot_dimension_numbers<[2], [2], [1], [1], [0, 0, 0, 1, 1, 1], [0], [0]>} : vector<2x8x8xf32>, vector<2x8x8xf32>, vector<2x8x8xf32> -> vector<2x8x8xf32>
    "tpu.trace_stop"() : () -> ()
    %cst_35 = arith.constant 0.176776692 : f32
    %68 = vector.broadcast %cst_35 : f32 to vector<2x8x8xf32>
    %69 = arith.mulf %67, %68 : vector<2x8x8xf32>
    %cst_36 = arith.constant dense<0xFF800000> : vector<2x8xf32>
    %70 = vector.multi_reduction <maximumf>, %69, %cst_36 [2] : vector<2x8x8xf32> to vector<2x8xf32>
    %71 = vector.shape_cast %70 : vector<2x8xf32> to vector<2x8x1xf32>
    %72 = vector.broadcast %71 : vector<2x8x1xf32> to vector<2x8x8xf32>
    %73 = arith.subf %69, %72 : vector<2x8x8xf32>
    %74 = math.exp %73 : vector<2x8x8xf32>
    %cst_37 = arith.constant dense<0.000000e+00> : vector<2x8xf32>
    %75 = vector.multi_reduction <add>, %74, %cst_37 [2] : vector<2x8x8xf32> to vector<2x8xf32>
    %76 = vector.shape_cast %75 : vector<2x8xf32> to vector<2x8x1xf32>
    %77 = tpu.reciprocal %76 {approx = true} : vector<2x8x1xf32> -> vector<2x8x1xf32>
    %78 = vector.broadcast %77 : vector<2x8x1xf32> to vector<2x8x8xf32>
    %79 = arith.mulf %74, %78 : vector<2x8x8xf32>
    "tpu.trace_start"() <{level = 10 : i32, message = "nqk,nkd->nqd"}> : () -> ()
    %cst_38 = arith.constant dense<0.000000e+00> : vector<2x8x8xf32>
    %80 = tpu.matmul %79, %66, %cst_38 {dimension_numbers = #tpu.dot_dimension_numbers<[2], [1], [1], [2], [0, 0, 0, 1, 1, 2], [0], [0]>} : vector<2x8x8xf32>, vector<2x8x8xf32>, vector<2x8x8xf32> -> vector<2x8x8xf32>
    "tpu.trace_stop"() : () -> ()
    %81 = vector.shape_cast %80 : vector<2x8x8xf32> to vector<16x8xf32>
    %82 = vector.extract_strided_slice %11 {offsets = [16, 0], sizes = [8, 32], strides = [1, 1]} : vector<32x32xf32> to vector<8x32xf32>
    %cst_39 = arith.constant dense<0.000000e+00> : vector<16x32xf32>
    %83 = tpu.matmul %81, %82, %cst_39 {dimension_numbers = #tpu.dot_dimension_numbers<[1], [0], [0], [1], [0, 0, 1, 1], [], []>} : vector<16x8xf32>, vector<8x32xf32>, vector<16x32xf32> -> vector<16x32xf32>
    %84 = vector.extract_strided_slice %3 {offsets = [0, 24], sizes = [16, 8], strides = [1, 1]} : vector<16x32xf32> to vector<16x8xf32>
    %cst_40 = arith.constant dense<0.000000e+00> : vector<16x8xf32>
    %85 = tpu.matmul %84, %5, %cst_40 {dimension_numbers = #tpu.dot_dimension_numbers<[1], [0], [0], [1], [0, 0, 1, 1], [], []>} : vector<16x8xf32>, vector<8x8xf32>, vector<16x8xf32> -> vector<16x8xf32>
    %86 = vector.shape_cast %85 : vector<16x8xf32> to vector<2x8x8xf32>
    %cst_41 = arith.constant dense<0.000000e+00> : vector<16x8xf32>
    %87 = tpu.matmul %84, %7, %cst_41 {dimension_numbers = #tpu.dot_dimension_numbers<[1], [0], [0], [1], [0, 0, 1, 1], [], []>} : vector<16x8xf32>, vector<8x8xf32>, vector<16x8xf32> -> vector<16x8xf32>
    %88 = vector.shape_cast %87 : vector<16x8xf32> to vector<2x8x8xf32>
    %cst_42 = arith.constant dense<0.000000e+00> : vector<16x8xf32>
    %89 = tpu.matmul %84, %9, %cst_42 {dimension_numbers = #tpu.dot_dimension_numbers<[1], [0], [0], [1], [0, 0, 1, 1], [], []>} : vector<16x8xf32>, vector<8x8xf32>, vector<16x8xf32> -> vector<16x8xf32>
    %90 = vector.shape_cast %89 : vector<16x8xf32> to vector<2x8x8xf32>
    "tpu.trace_start"() <{level = 10 : i32, message = "nqd,nkd->nqk"}> : () -> ()
    %cst_43 = arith.constant dense<0.000000e+00> : vector<2x8x8xf32>
    %91 = tpu.matmul %86, %88, %cst_43 {dimension_numbers = #tpu.dot_dimension_numbers<[2], [2], [1], [1], [0, 0, 0, 1, 1, 1], [0], [0]>} : vector<2x8x8xf32>, vector<2x8x8xf32>, vector<2x8x8xf32> -> vector<2x8x8xf32>
    "tpu.trace_stop"() : () -> ()
    %cst_44 = arith.constant 0.176776692 : f32
    %92 = vector.broadcast %cst_44 : f32 to vector<2x8x8xf32>
    %93 = arith.mulf %91, %92 : vector<2x8x8xf32>
    %cst_45 = arith.constant dense<0xFF800000> : vector<2x8xf32>
    %94 = vector.multi_reduction <maximumf>, %93, %cst_45 [2] : vector<2x8x8xf32> to vector<2x8xf32>
    %95 = vector.shape_cast %94 : vector<2x8xf32> to vector<2x8x1xf32>
    %96 = vector.broadcast %95 : vector<2x8x1xf32> to vector<2x8x8xf32>
    %97 = arith.subf %93, %96 : vector<2x8x8xf32>
    %98 = math.exp %97 : vector<2x8x8xf32>
    %cst_46 = arith.constant dense<0.000000e+00> : vector<2x8xf32>
    %99 = vector.multi_reduction <add>, %98, %cst_46 [2] : vector<2x8x8xf32> to vector<2x8xf32>
    %100 = vector.shape_cast %99 : vector<2x8xf32> to vector<2x8x1xf32>
    %101 = tpu.reciprocal %100 {approx = true} : vector<2x8x1xf32> -> vector<2x8x1xf32>
    %102 = vector.broadcast %101 : vector<2x8x1xf32> to vector<2x8x8xf32>
    %103 = arith.mulf %98, %102 : vector<2x8x8xf32>
    "tpu.trace_start"() <{level = 10 : i32, message = "nqk,nkd->nqd"}> : () -> ()
    %cst_47 = arith.constant dense<0.000000e+00> : vector<2x8x8xf32>
    %104 = tpu.matmul %103, %90, %cst_47 {dimension_numbers = #tpu.dot_dimension_numbers<[2], [1], [1], [2], [0, 0, 0, 1, 1, 2], [0], [0]>} : vector<2x8x8xf32>, vector<2x8x8xf32>, vector<2x8x8xf32> -> vector<2x8x8xf32>
    "tpu.trace_stop"() : () -> ()
    %105 = vector.shape_cast %104 : vector<2x8x8xf32> to vector<16x8xf32>
    %106 = vector.extract_strided_slice %11 {offsets = [24, 0], sizes = [8, 32], strides = [1, 1]} : vector<32x32xf32> to vector<8x32xf32>
    %cst_48 = arith.constant dense<0.000000e+00> : vector<16x32xf32>
    %107 = tpu.matmul %105, %106, %cst_48 {dimension_numbers = #tpu.dot_dimension_numbers<[1], [0], [0], [1], [0, 0, 1, 1], [], []>} : vector<16x8xf32>, vector<8x32xf32>, vector<16x32xf32> -> vector<16x32xf32>
    %108 = arith.addf %35, %59 : vector<16x32xf32>
    %109 = arith.addf %108, %83 : vector<16x32xf32>
    %110 = arith.addf %109, %107 : vector<16x32xf32>
    %c0_49 = arith.constant 0 : index
    %c0_50 = arith.constant 0 : index
    %c0_51 = arith.constant 0 : index
    %111 = vector.load %arg6[%c0_49, %c0_50, %c0_51] : memref<1x1x32xf32, #tpu.memory_space<vmem>>, vector<1x1x32xf32>
    %112 = vector.shape_cast %111 : vector<1x1x32xf32> to vector<1x32xf32>
    %113 = vector.broadcast %112 : vector<1x32xf32> to vector<16x32xf32>
    %114 = arith.addf %110, %113 : vector<16x32xf32>
    %115 = arith.addf %114, %3 : vector<16x32xf32>
    %c0_52 = arith.constant 0 : index
    %c0_53 = arith.constant 0 : index
    %c0_54 = arith.constant 0 : index
    %116 = vector.load %arg7[%c0_52, %c0_53, %c0_54] : memref<1x1x32xf32, #tpu.memory_space<vmem>>, vector<1x1x32xf32>
    %117 = vector.shape_cast %116 : vector<1x1x32xf32> to vector<1x32xf32>
    %c0_55 = arith.constant 0 : index
    %c0_56 = arith.constant 0 : index
    %c0_57 = arith.constant 0 : index
    %118 = vector.load %arg8[%c0_55, %c0_56, %c0_57] : memref<1x1x32xf32, #tpu.memory_space<vmem>>, vector<1x1x32xf32>
    %119 = vector.shape_cast %118 : vector<1x1x32xf32> to vector<1x32xf32>
    %cst_58 = arith.constant dense<0.000000e+00> : vector<16xf32>
    %120 = vector.multi_reduction <add>, %115, %cst_58 [1] : vector<16x32xf32> to vector<16xf32>
    %121 = vector.shape_cast %120 : vector<16xf32> to vector<16x1xf32>
    %cst_59 = arith.constant 3.200000e+01 : f32
    %122 = vector.broadcast %cst_59 : f32 to vector<16x1xf32>
    %123 = arith.divf %121, %122 : vector<16x1xf32>
    %124 = vector.broadcast %123 : vector<16x1xf32> to vector<16x32xf32>
    %125 = arith.subf %115, %124 : vector<16x32xf32>
    %126 = arith.mulf %125, %125 : vector<16x32xf32>
    %cst_60 = arith.constant dense<0.000000e+00> : vector<16xf32>
    %127 = vector.multi_reduction <add>, %126, %cst_60 [1] : vector<16x32xf32> to vector<16xf32>
    %128 = vector.shape_cast %127 : vector<16xf32> to vector<16x1xf32>
    %cst_61 = arith.constant 3.200000e+01 : f32
    %129 = vector.broadcast %cst_61 : f32 to vector<16x1xf32>
    %130 = arith.divf %128, %129 : vector<16x1xf32>
    %131 = vector.broadcast %123 : vector<16x1xf32> to vector<16x32xf32>
    %132 = arith.subf %115, %131 : vector<16x32xf32>
    %cst_62 = arith.constant 9.99999974E-6 : f32
    %133 = vector.broadcast %cst_62 : f32 to vector<16x1xf32>
    %134 = arith.addf %130, %133 : vector<16x1xf32>
    %135 = math.rsqrt %134 : vector<16x1xf32>
    %136 = vector.broadcast %135 : vector<16x1xf32> to vector<16x32xf32>
    %137 = arith.mulf %132, %136 : vector<16x32xf32>
    %138 = vector.broadcast %117 : vector<1x32xf32> to vector<16x32xf32>
    %139 = arith.mulf %137, %138 : vector<16x32xf32>
    %140 = vector.broadcast %119 : vector<1x32xf32> to vector<16x32xf32>
    %141 = arith.addf %139, %140 : vector<16x32xf32>
    %c0_63 = arith.constant 0 : index
    %c0_64 = arith.constant 0 : index
    %c0_65 = arith.constant 0 : index
    %142 = vector.load %arg9[%c0_63, %c0_64, %c0_65] : memref<1x32x128xf32, #tpu.memory_space<vmem>>, vector<1x32x128xf32>
    %143 = vector.shape_cast %142 : vector<1x32x128xf32> to vector<32x128xf32>
    %cst_66 = arith.constant dense<0.000000e+00> : vector<16x128xf32>
    %144 = tpu.matmul %141, %143, %cst_66 {dimension_numbers = #tpu.dot_dimension_numbers<[1], [0], [0], [1], [0, 0, 1, 1], [], []>} : vector<16x32xf32>, vector<32x128xf32>, vector<16x128xf32> -> vector<16x128xf32>
    %c0_67 = arith.constant 0 : index
    %c0_68 = arith.constant 0 : index
    %c0_69 = arith.constant 0 : index
    %145 = vector.load %arg10[%c0_67, %c0_68, %c0_69] : memref<1x1x128xf32, #tpu.memory_space<vmem>>, vector<1x1x128xf32>
    %146 = vector.shape_cast %145 : vector<1x1x128xf32> to vector<1x128xf32>
    %147 = vector.broadcast %146 : vector<1x128xf32> to vector<16x128xf32>
    %148 = arith.addf %144, %147 : vector<16x128xf32>
    %cst_70 = arith.constant 0.000000e+00 : f32
    %149 = vector.broadcast %cst_70 : f32 to vector<16x128xf32>
    %150 = arith.maximumf %148, %149 : vector<16x128xf32>
    %c0_71 = arith.constant 0 : index
    %c0_72 = arith.constant 0 : index
    %c0_73 = arith.constant 0 : index
    %151 = vector.load %arg11[%c0_71, %c0_72, %c0_73] : memref<1x128x32xf32, #tpu.memory_space<vmem>>, vector<1x128x32xf32>
    %152 = vector.shape_cast %151 : vector<1x128x32xf32> to vector<128x32xf32>
    %cst_74 = arith.constant dense<0.000000e+00> : vector<16x32xf32>
    %153 = tpu.matmul %150, %152, %cst_74 {dimension_numbers = #tpu.dot_dimension_numbers<[1], [0], [0], [1], [0, 0, 1, 1], [], []>} : vector<16x128xf32>, vector<128x32xf32>, vector<16x32xf32> -> vector<16x32xf32>
    %c0_75 = arith.constant 0 : index
    %c0_76 = arith.constant 0 : index
    %c0_77 = arith.constant 0 : index
    %154 = vector.load %arg12[%c0_75, %c0_76, %c0_77] : memref<1x1x32xf32, #tpu.memory_space<vmem>>, vector<1x1x32xf32>
    %155 = vector.shape_cast %154 : vector<1x1x32xf32> to vector<1x32xf32>
    %156 = vector.broadcast %155 : vector<1x32xf32> to vector<16x32xf32>
    %157 = arith.addf %153, %156 : vector<16x32xf32>
    %158 = arith.addf %157, %141 : vector<16x32xf32>
    %c0_78 = arith.constant 0 : index
    %c0_79 = arith.constant 0 : index
    %c0_80 = arith.constant 0 : index
    %159 = vector.load %arg13[%c0_78, %c0_79, %c0_80] : memref<1x1x32xf32, #tpu.memory_space<vmem>>, vector<1x1x32xf32>
    %160 = vector.shape_cast %159 : vector<1x1x32xf32> to vector<1x32xf32>
    %c0_81 = arith.constant 0 : index
    %c0_82 = arith.constant 0 : index
    %c0_83 = arith.constant 0 : index
    %161 = vector.load %arg14[%c0_81, %c0_82, %c0_83] : memref<1x1x32xf32, #tpu.memory_space<vmem>>, vector<1x1x32xf32>
    %162 = vector.shape_cast %161 : vector<1x1x32xf32> to vector<1x32xf32>
    %cst_84 = arith.constant dense<0.000000e+00> : vector<16xf32>
    %163 = vector.multi_reduction <add>, %158, %cst_84 [1] : vector<16x32xf32> to vector<16xf32>
    %164 = vector.shape_cast %163 : vector<16xf32> to vector<16x1xf32>
    %cst_85 = arith.constant 3.200000e+01 : f32
    %165 = vector.broadcast %cst_85 : f32 to vector<16x1xf32>
    %166 = arith.divf %164, %165 : vector<16x1xf32>
    %167 = vector.broadcast %166 : vector<16x1xf32> to vector<16x32xf32>
    %168 = arith.subf %158, %167 : vector<16x32xf32>
    %169 = arith.mulf %168, %168 : vector<16x32xf32>
    %cst_86 = arith.constant dense<0.000000e+00> : vector<16xf32>
    %170 = vector.multi_reduction <add>, %169, %cst_86 [1] : vector<16x32xf32> to vector<16xf32>
    %171 = vector.shape_cast %170 : vector<16xf32> to vector<16x1xf32>
    %cst_87 = arith.constant 3.200000e+01 : f32
    %172 = vector.broadcast %cst_87 : f32 to vector<16x1xf32>
    %173 = arith.divf %171, %172 : vector<16x1xf32>
    %174 = vector.broadcast %166 : vector<16x1xf32> to vector<16x32xf32>
    %175 = arith.subf %158, %174 : vector<16x32xf32>
    %cst_88 = arith.constant 9.99999974E-6 : f32
    %176 = vector.broadcast %cst_88 : f32 to vector<16x1xf32>
    %177 = arith.addf %173, %176 : vector<16x1xf32>
    %178 = math.rsqrt %177 : vector<16x1xf32>
    %179 = vector.broadcast %178 : vector<16x1xf32> to vector<16x32xf32>
    %180 = arith.mulf %175, %179 : vector<16x32xf32>
    %181 = vector.broadcast %160 : vector<1x32xf32> to vector<16x32xf32>
    %182 = arith.mulf %180, %181 : vector<16x32xf32>
    %183 = vector.broadcast %162 : vector<1x32xf32> to vector<16x32xf32>
    %184 = arith.addf %182, %183 : vector<16x32xf32>
    %185 = arith.addf %184, %3 : vector<16x32xf32>
    %c0_89 = arith.constant 0 : index
    %c0_90 = arith.constant 0 : index
    %c0_91 = arith.constant 0 : index
    %186 = vector.load %arg15[%c0_89, %c0_90, %c0_91] : memref<1x1x32xf32, #tpu.memory_space<vmem>>, vector<1x1x32xf32>
    %187 = vector.shape_cast %186 : vector<1x1x32xf32> to vector<1x32xf32>
    %c0_92 = arith.constant 0 : index
    %c0_93 = arith.constant 0 : index
    %c0_94 = arith.constant 0 : index
    %188 = vector.load %arg16[%c0_92, %c0_93, %c0_94] : memref<1x1x32xf32, #tpu.memory_space<vmem>>, vector<1x1x32xf32>
    %189 = vector.shape_cast %188 : vector<1x1x32xf32> to vector<1x32xf32>
    %cst_95 = arith.constant dense<0.000000e+00> : vector<16xf32>
    %190 = vector.multi_reduction <add>, %185, %cst_95 [1] : vector<16x32xf32> to vector<16xf32>
    %191 = vector.shape_cast %190 : vector<16xf32> to vector<16x1xf32>
    %cst_96 = arith.constant 3.200000e+01 : f32
    %192 = vector.broadcast %cst_96 : f32 to vector<16x1xf32>
    %193 = arith.divf %191, %192 : vector<16x1xf32>
    %194 = vector.broadcast %193 : vector<16x1xf32> to vector<16x32xf32>
    %195 = arith.subf %185, %194 : vector<16x32xf32>
    %196 = arith.mulf %195, %195 : vector<16x32xf32>
    %cst_97 = arith.constant dense<0.000000e+00> : vector<16xf32>
    %197 = vector.multi_reduction <add>, %196, %cst_97 [1] : vector<16x32xf32> to vector<16xf32>
    %198 = vector.shape_cast %197 : vector<16xf32> to vector<16x1xf32>
    %cst_98 = arith.constant 3.200000e+01 : f32
    %199 = vector.broadcast %cst_98 : f32 to vector<16x1xf32>
    %200 = arith.divf %198, %199 : vector<16x1xf32>
    %201 = vector.broadcast %193 : vector<16x1xf32> to vector<16x32xf32>
    %202 = arith.subf %185, %201 : vector<16x32xf32>
    %cst_99 = arith.constant 9.99999974E-6 : f32
    %203 = vector.broadcast %cst_99 : f32 to vector<16x1xf32>
    %204 = arith.addf %200, %203 : vector<16x1xf32>
    %205 = math.rsqrt %204 : vector<16x1xf32>
    %206 = vector.broadcast %205 : vector<16x1xf32> to vector<16x32xf32>
    %207 = arith.mulf %202, %206 : vector<16x32xf32>
    %208 = vector.broadcast %187 : vector<1x32xf32> to vector<16x32xf32>
    %209 = arith.mulf %207, %208 : vector<16x32xf32>
    %210 = vector.broadcast %189 : vector<1x32xf32> to vector<16x32xf32>
    %211 = arith.addf %209, %210 : vector<16x32xf32>
    %c0_100 = arith.constant 0 : index
    %c0_101 = arith.constant 0 : index
    %212 = vector.load %arg18[%c0_100, %c0_101] : memref<16x32xf32, #tpu.memory_space<vmem>>, vector<16x32xf32>
    tpu.vector_store %arg18[%c0_100, %c0_101], %211 {strides = array<i32>} : memref<16x32xf32, #tpu.memory_space<vmem>>, vector<16x32xf32>,
    %c1_i32 = arith.constant 1 : i32
    %213 = arith.cmpi eq, %arg0, %c1_i32 : i32
    %214 = arith.extui %213 : i1 to i32
    %c0_i32_102 = arith.constant 0 : i32
    %215 = arith.cmpi ne, %214, %c0_i32_102 : i32
    scf.if %215 {
      %c0_103 = arith.constant 0 : index
      %c0_104 = arith.constant 0 : index
      %216 = vector.load %arg17[%c0_103, %c0_104] : memref<16x32xf32, #tpu.memory_space<vmem>>, vector<16x32xf32>
      tpu.vector_store %arg17[%c0_103, %c0_104], %211 {strides = array<i32>} : memref<16x32xf32, #tpu.memory_space<vmem>>, vector<16x32xf32>,
    } else {
    }
    return
  }
  func.func @transform_0(%arg0: i32) -> (i32, i32) {
    %c0_i32 = arith.constant 0 : i32
    %c0_i32_0 = arith.constant 0 : i32
    %c0_i32_1 = arith.constant 0 : i32
    return %c0_i32, %c0_i32_0 : i32, i32
  }
  func.func @transform_1(%arg0: i32) -> (i32, i32, i32) {
    %c0_i32 = arith.constant 0 : i32
    %c0_i32_0 = arith.constant 0 : i32
    %c0_i32_1 = arith.constant 0 : i32
    return %arg0, %c0_i32, %c0_i32_0 : i32, i32, i32
  }
  func.func @transform_2(%arg0: i32) -> (i32, i32, i32) {
    %c0_i32 = arith.constant 0 : i32
    %c0_i32_0 = arith.constant 0 : i32
    %c0_i32_1 = arith.constant 0 : i32
    return %arg0, %c0_i32, %c0_i32_0 : i32, i32, i32
  }
  func.func @transform_3(%arg0: i32) -> (i32, i32, i32) {
    %c0_i32 = arith.constant 0 : i32
    %c0_i32_0 = arith.constant 0 : i32
    %c0_i32_1 = arith.constant 0 : i32
    return %arg0, %c0_i32, %c0_i32_0 : i32, i32, i32
  }
  func.func @transform_4(%arg0: i32) -> (i32, i32, i32) {
    %c0_i32 = arith.constant 0 : i32
    %c0_i32_0 = arith.constant 0 : i32
    %c0_i32_1 = arith.constant 0 : i32
    return %arg0, %c0_i32, %c0_i32_0 : i32, i32, i32
  }
  func.func @transform_5(%arg0: i32) -> (i32, i32, i32) {
    %c0_i32 = arith.constant 0 : i32
    %c0_i32_0 = arith.constant 0 : i32
    %c0_i32_1 = arith.constant 0 : i32
    return %arg0, %c0_i32, %c0_i32_0 : i32, i32, i32
  }
  func.func @transform_6(%arg0: i32) -> (i32, i32, i32) {
    %c0_i32 = arith.constant 0 : i32
    %c0_i32_0 = arith.constant 0 : i32
    %c0_i32_1 = arith.constant 0 : i32
    return %arg0, %c0_i32, %c0_i32_0 : i32, i32, i32
  }
  func.func @transform_7(%arg0: i32) -> (i32, i32, i32) {
    %c0_i32 = arith.constant 0 : i32
    %c0_i32_0 = arith.constant 0 : i32
    %c0_i32_1 = arith.constant 0 : i32
    return %arg0, %c0_i32, %c0_i32_0 : i32, i32, i32
  }
  func.func @transform_8(%arg0: i32) -> (i32, i32, i32) {
    %c0_i32 = arith.constant 0 : i32
    %c0_i32_0 = arith.constant 0 : i32
    %c0_i32_1 = arith.constant 0 : i32
    return %arg0, %c0_i32, %c0_i32_0 : i32, i32, i32
  }
  func.func @transform_9(%arg0: i32) -> (i32, i32, i32) {
    %c0_i32 = arith.constant 0 : i32
    %c0_i32_0 = arith.constant 0 : i32
    %c0_i32_1 = arith.constant 0 : i32
    return %arg0, %c0_i32, %c0_i32_0 : i32, i32, i32
  }
  func.func @transform_10(%arg0: i32) -> (i32, i32, i32) {
    %c0_i32 = arith.constant 0 : i32
    %c0_i32_0 = arith.constant 0 : i32
    %c0_i32_1 = arith.constant 0 : i32
    return %arg0, %c0_i32, %c0_i32_0 : i32, i32, i32
  }
  func.func @transform_11(%arg0: i32) -> (i32, i32, i32) {
    %c0_i32 = arith.constant 0 : i32
    %c0_i32_0 = arith.constant 0 : i32
    %c0_i32_1 = arith.constant 0 : i32
    return %arg0, %c0_i32, %c0_i32_0 : i32, i32, i32
  }
  func.func @transform_12(%arg0: i32) -> (i32, i32, i32) {
    %c0_i32 = arith.constant 0 : i32
    %c0_i32_0 = arith.constant 0 : i32
    %c0_i32_1 = arith.constant 0 : i32
    return %arg0, %c0_i32, %c0_i32_0 : i32, i32, i32
  }
  func.func @transform_13(%arg0: i32) -> (i32, i32, i32) {
    %c0_i32 = arith.constant 0 : i32
    %c0_i32_0 = arith.constant 0 : i32
    %c0_i32_1 = arith.constant 0 : i32
    return %arg0, %c0_i32, %c0_i32_0 : i32, i32, i32
  }
  func.func @transform_14(%arg0: i32) -> (i32, i32, i32) {
    %c0_i32 = arith.constant 0 : i32
    %c0_i32_0 = arith.constant 0 : i32
    %c0_i32_1 = arith.constant 0 : i32
    return %arg0, %c0_i32, %c0_i32_0 : i32, i32, i32
  }
  func.func @transform_15(%arg0: i32) -> (i32, i32, i32) {
    %c0_i32 = arith.constant 0 : i32
    %c0_i32_0 = arith.constant 0 : i32
    %c0_i32_1 = arith.constant 0 : i32
    return %arg0, %c0_i32, %c0_i32_0 : i32, i32, i32
  }
  func.func @transform_16(%arg0: i32) -> (i32, i32) {
    %c0_i32 = arith.constant 0 : i32
    %c0_i32_0 = arith.constant 0 : i32
    %c0_i32_1 = arith.constant 0 : i32
    return %c0_i32, %c0_i32_0 : i32, i32
  }
}

</mosaic_0001>

<bundles_post_ra>
// kernel: tpu_custom_call.1
= control target key start
LH: loop header
LB: loop body
LE: loop exit
PB: predicated region body
PF: predicated region fallthrough
CT: control target
= control target key end

     0   :  { %s2745_s0 = inlined_call_operand.vmem [shape: f32[16,32], index: 0, kind: input, shape index: {}]   ;;  %s2746_s1 = inlined_call_operand.vmem [shape: f32[2,8,8], index: 1, kind: input, shape index: {}]   ;;  %s2747_s2 = inlined_call_operand.vmem [shape: f32[2,8,8], index: 2, kind: input, shape index: {}]   ;;  %s2748_s3 = inlined_call_operand.vmem [shape: f32[2,8,8], index: 3, kind: input, shape index: {}]   ;;  %s2749_s4 = inlined_call_operand.vmem [shape: f32[2,32,32], index: 4, kind: input, shape index: {}]   ;;  %s2750_s5 = inlined_call_operand.vmem [shape: f32[2,1,32], index: 5, kind: input, shape index: {}]   ;;  %s2751_s6 = inlined_call_operand.vmem [shape: f32[2,1,32], index: 6, kind: input, shape index: {}]   ;;  %s2752_s7 = inlined_call_operand.vmem [shape: f32[2,1,32], index: 7, kind: input, shape index: {}]   ;;  %s2753_s8 = inlined_call_operand.vmem [shape: f32[2,32,128], index: 8, kind: input, shape index: {}]   ;;  %s2754_s9 = inlined_call_operand.vmem [shape: f32[2,1,128], index: 9, kind: input, shape index: {}]   ;;  %s2755_s10 = inlined_call_operand.vmem [shape: f32[2,128,32], index: 10, kind: input, shape index: {}]   ;;  %s2756_s11 = inlined_call_operand.vmem [shape: f32[2,1,32], index: 11, kind: input, shape index: {}]   ;;  %s2757_s12 = inlined_call_operand.vmem [shape: f32[2,1,32], index: 12, kind: input, shape index: {}]   ;;  %s2758_s13 = inlined_call_operand.vmem [shape: f32[2,1,32], index: 13, kind: input, shape index: {}]   ;;  %s2759_s14 = inlined_call_operand.vmem [shape: f32[2,1,32], index: 14, kind: input, shape index: {}]   ;;  %s2760_s15 = inlined_call_operand.vmem [shape: f32[2,1,32], index: 15, kind: input, shape index: {}]   ;;  %s2761_s16 = inlined_call_operand.hbm [shape: f32[16,32], index: 16, kind: output, shape index: {}]  }
   0x1   :  { %2765 = sst [smem:[#allocation8_spill]] %s2745_s0 }
   0x2   :  { %2766 = sst [smem:[#allocation9_spill]] %s2746_s1 }
   0x3   :  { %2767 = sst [smem:[#allocation10_spill]] %s2747_s2 }
   0x4   :  { %2768 = sst [smem:[#allocation11_spill]] %s2749_s4 }
   0x5   :  { %2769 = sst [smem:[#allocation12_spill]] %s2752_s7 }
   0x6   :  { %2770 = sst [smem:[#allocation13_spill]] %s2753_s8 }
   0x7   :  { %2771 = sst [smem:[#allocation14_spill]] %s2754_s9 }
   0x8   :  { %2772 = sst [smem:[#allocation15_spill]] %s2755_s10 }
   0x9   :  { %2773 = sst [smem:[#allocation16_spill]] %s2758_s13 }
   0xa   :  { %2774 = sst [smem:[#allocation17_spill]] %s2759_s14 }
   0xb   :  { %2775 = sst [smem:[#allocation18_spill]] %s2760_s15 }
   0xc   :  { %2776 = sst [smem:[#allocation19_spill]] %s2761_s16 }
   0xd   :  { %21 = vsyncpa [#allocation4], 0  ;;  %s2415_s21 = smov 0  }
   0xe LB: > { %2777 = sst [smem:[#allocation6_spill]] %s2321_s21  ;;  %s2421_s22 = sadd.s32 4294967295, %s2321_s21   ;;  %s2321_s21 = sphi %s2415_s21, %s27_s21  }
   0xf   : > { %2778 = sst [smem:[#allocation7_spill]] %s2421_s22  ;;  %p2130_p0 = scmp.ge.s32.totalorder %s2321_s21, 1 }
  0x10   : > { %p577_p1 = scmp.lt.s32.totalorder %s2321_s21, 3 }
  0x12   : > { %p578_p2 = pnand %p2130_p0, %p577_p1 }
  0x13   : > { %p671_p3 = scmp.lt.s32.totalorder (!%p578_p2), %s2421_s22, 1  ;;  %s2779_s1 = sld [smem:[#allocation9_spill]] (!%p578_p2) }
  0x14   : > { %581 = sbr.rel (%p578_p2) target bundleno = 3401 (0xd49), region = 84  ;;  %s2780_s2 = sld [smem:[#allocation10_spill]] (!%p578_p2) }
  0x15   : > { %s2781_s4 = sld [smem:[#allocation11_spill]] (!%p578_p2) }
  0x16   : > { %s2783_s8 = sld [smem:[#allocation13_spill]] (!%p578_p2) }
  0x17   : > { %s2785_s10 = sld [smem:[#allocation15_spill]] (!%p578_p2) }
  0x18   : > { %s2787_s19 = sld [smem:[#allocation17_spill]] (!%p578_p2) }
  0x19   : > { %s2427_s23 = scalar_select %p671_p3, %s2421_s22, 1 }
  0x1b   : > { %s2430_s24 = sshll.u32 %s2427_s23, 3  ;;  %s2204_s25 = sshll.u32 %s2427_s23, 5 }
  0x1c   : > { %s674_s28 = scalar_lea.vmem %s2779_s1, %s2430_s24  ;;  %s678_s0 = scalar_lea.vmem %s2780_s2, %s2430_s24 }
  0x1d   : > { %s2448_s16 = scalar_lea.vmem %s2781_s4, %s2204_s25  ;;  %s2465_s18 = scalar_lea.vmem %s2783_s8, %s2204_s25 }
  0x1e   : > { %s2206_s4 = sshll.u32 %s2427_s23, 7  ;;  %s715_s2 = scalar_lea.vmem %s2757_s12, %s2427_s23 }
  0x1f   : > { %s2475_s14 = scalar_lea.vmem %s2785_s10, %s2206_s4  ;;  %s2786_s1 = sld [smem:[#allocation16_spill]] }
  0x20   : > { %s721_s9 = scalar_lea.vmem %s2787_s19, %s2427_s23  ;;  %s2788_s4 = sld [smem:[#allocation18_spill]] }
  0x21   : > { %s2789_s10 = sld [smem:[#allocation7_spill]] }
  0x25   : > { %s718_s8 = scalar_lea.vmem %s2786_s1, %s2427_s23 }
  0x26   : > { %s724_s22 = scalar_lea.vmem %s2788_s4, %s2427_s23 }
  0x27   : > { %p2140_p4 = scmp.ne.s32.totalorder %s2789_s10, 0 }
  0x28   : > { %s2790_s13 = sld [smem:[#allocation8_spill]] (!%p2140_p4) }
  0x29   : > { %728 = sbr.rel (%p2140_p4) target bundleno = 49 (0x31), region = 88 }
  0x2e   : > { %v729_v0 = vld [vmem:[%s2790_s13] sm:$0xff]  ;;  %vm731_vm0 = vcmask 261120   ;;  %v730_v1 = vld [vmem:[%s2790_s13 + $0x8] sm:$0xff] }
  0x2f   : > { %732 = vst.msk [vmem:[#allocation2] sm:$0xff] %vm731_vm0, %v729_v0 }
  0x30   : > { %733 = vst.msk [vmem:[#allocation2 + $0x8] sm:$0xff] %vm731_vm0, %v730_v1 }
  0x31 PF: > { %v2504_v2 = vld [vmem:[%s678_s0] sm:$0xff]  ;;  %vm743_vm1 = vcmask 64512   ;;  %s2323_s1 = smov 120   ;;  %s2325_s0 = smov 104   ;;  %vm1668_vm2 = vcmask 261120  }
  0x32   : > { %v2508_v4 = vld [vmem:[%s674_s28] sm:$0xff]  ;;  %788 = vmatpush.msra.mxu1 %v2504_v2  ;;  %s2791_s28 = scalar_lea.vmem %s2748_s3, %s2430_s24  ;;  %s2324_s24 = smov 112  }
  0x33   : > { %765 = vmatpush.msra.mxu0 %v2508_v4  ;;  %v2536_v16 = vld [vmem:[%s2791_s28] sm:$0xff]  ;;  %s2792_s17 = scalar_lea.vmem %s2750_s5, %s2427_s23  ;;  %s2793_s21 = scalar_lea.vmem %s2751_s6, %s2427_s23 }
  0x34   : > { %811 = vmatpush.msra.mxu2 %v2536_v16  ;;  %s2794_s4 = sld [smem:[#allocation12_spill]]  ;;  %s2798_s28 = scalar_lea.vmem %s2756_s11, %s2427_s23 }
  0x35   : > { %s2796_s29 = sld [smem:[#allocation14_spill]] }
  0x36   : > { %v2506_v3 = vld [vmem:[#allocation2] sm:$0xff]  ;;  %964 = vmatpush.msrb.mxu2 %v2508_v4 }
  0x37   : > { %2143 = vmatmul.msk.f32.vlgmr.msra.gmra.mxu1 %vm743_vm1, %v2506_v3  ;;  %2141 = vmatmul.msk.f32.vlgmr.msra.gmra.mxu0 %vm743_vm1, %v2506_v3  ;;  %v2516_v5 = vld [vmem:[#allocation2 + $0x8] sm:$0xff] }
  0x38   : > { %941 = vrot.lane.b32.xlu0 %v2506_v3, %s2323_s1  ;;  %2145 = vmatmul.msk.f32.vlgmr.msra.gmra.mxu2 %vm743_vm1, %v2506_v3 }
  0x3a   : > { %s2795_s26 = scalar_lea.vmem %s2794_s4, %s2427_s23 }
  0x3f   : > { %2144 = vmatmul.msk.f32.gmra.mxu1 %vm743_vm1, %v2516_v5  ;;  %2142 = vmatmul.msk.f32.gmra.mxu0 %vm743_vm1, %v2516_v5 }
  0x40   : > { %943 = vrot.lane.b32.xlu0 %v2516_v5, %s2323_s1  ;;  %2146 = vmatmul.msk.f32.gmra.mxu2 %vm743_vm1, %v2516_v5  ;;  %s2797_s1 = scalar_lea.vmem %s2796_s29, %s2427_s23 }
  0xaa   : > { %v942_v17 = vpop.permute.xlu0 %941 }
  0xab   : > { %2153 = vmatmul.msk.f32.vlgmr.msrb.gmra.mxu2 %vm743_vm1, %v942_v17 }
  0xb2   : > { %v944_v18 = vpop.permute.xlu0 %943 }
  0xb3   : > { %2154 = vmatmul.msk.f32.gmra.mxu2 %vm743_vm1, %v944_v18 }
  0xb4   : > { %v790_v6 = vpop.f32.mrf.mxu1  ;;  %v767_v7 = vpop.f32.mrf.mxu0 }
  0xb5   : > { %2147 = vmatpush.xpose.msk.msrb.mxu1 %vm743_vm1, %v790_v6 }
  0xb8   : > { %2148 = vmatmul.msk.f32.vlgmr.msrb.gmra.mxu1 %vm743_vm1, %v767_v7 }
  0xbb   : > { %v813_v29 = vpop.f32.mrf.mxu2 }
  0xbc   : > { %v793_v8 = vpop.f32.mrf.mxu1  ;;  %v770_v9 = vpop.f32.mrf.mxu0  ;;  %913 = vmatpush.msrb.mxu0 %v813_v29 }
  0xbd   : > { %2149 = vmatpush.xpose.msk.msra.mxu3 %vm743_vm1, %v793_v8 }
  0xbe   : > { %1010 = vmatpush.msra.mxu0 %v2536_v16 }
  0xc0   : > { %2150 = vmatmul.msk.f32.vlgmr.msra.gmra.mxu3 %vm743_vm1, %v770_v9  ;;  %v740_v9 = vld [vmem:[%s2448_s16 + $0x8] sm:$0xff] }
  0xc1   : > { %987 = vmatpush.msrb.mxu3 %v2504_v2 }
  0xc3   : > { %v816_v30 = vpop.f32.mrf.mxu2 }
  0xc4   : > { %936 = vmatpush.msra.mxu1 %v816_v30 }
  0xc8   : > { %2155 = vmatmul.msk.f32.vlgmr.msrb.gmra.mxu3 %vm743_vm1, %v942_v17 }
  0xd0   : > { %2156 = vmatmul.msk.f32.gmra.mxu3 %vm743_vm1, %v944_v18 }
 0x12e   : > { %v966_v39 = vpop.f32.mrf.mxu2 }
 0x135   : > { %v842_v10 = vpop.f32.mrf.mxu1 }
 0x136   : > { %v871_v11 = vmul.f32 0.17677669, %v842_v10  ;;  %v969_v40 = vpop.f32.mrf.mxu2 }
 0x138   : > { %v873_v12 = vsel %vm743_vm1, %v871_v11, -inf }
 0x139   : > { %874 = vmax.xlane.f32.xlu2 %v873_v12 }
 0x143   : > { %v868_v13 = vpop.f32.mrf.mxu3 }
 0x144   : > { %v872_v14 = vmul.f32 0.17677669, %v868_v13 }
 0x146   : > { %v876_v15 = vsel %vm743_vm1, %v872_v14, -inf }
 0x147   : > { %877 = vmax.xlane.f32.xlu1 %v876_v15 }
 0x14b   : > { %v989_v31 = vpop.f32.mrf.mxu3 }
 0x14c   : > { %2159 = vmatpush.xpose.msk.msrb.mxu1 %vm743_vm1, %v989_v31 }
 0x153   : > { %v992_v38 = vpop.f32.mrf.mxu3 }
 0x1ac   : > { %v875_v19 = vpop.xlane.xlu2 %874 }
 0x1ad   : > { %v879_v20 = vsub.f32 %v871_v11, %v875_v19 }
 0x1af   : > { %v881_v21 = vmul.f32 1.442695, %v879_v20 }
 0x1b1   : > { %2237 = vpow2.f32 %v881_v21 }
 0x1b7   : > { %v2238_v22 = vpop.eup %2237 }
 0x1b8   : > { %v885_v23 = vsel %vm743_vm1, %v2238_v22, 0.0 }
 0x1b9   : > { %886 = vadd.xlane.f32.xlu2 %v885_v23 }
 0x1ba   : > { %v878_v24 = vpop.xlane.xlu1 %877 }
 0x1bb   : > { %v880_v25 = vsub.f32 %v872_v14, %v878_v24 }
 0x1bd   : > { %v883_v26 = vmul.f32 1.442695, %v880_v25 }
 0x1bf   : > { %2239 = vpow2.f32 %v883_v26 }
 0x1c5   : > { %v2240_v27 = vpop.eup %2239 }
 0x1c6   : > { %v888_v28 = vsel %vm743_vm1, %v2240_v27, 0.0 }
 0x1c7   : > { %889 = vadd.xlane.f32.xlu1 %v888_v28 }
 0x22c   : > { %v887_v32 = vpop.xlane.xlu2 %886 }
 0x22d   : > { %2241 = vrcp.f32 %v887_v32 }
 0x233   : > { %v2242_v33 = vpop.eup %2241 }
 0x234   : > { %v893_v34 = vmul.f32 %v2242_v33, %v2238_v22 }
 0x236   : > { %2151 = vmatmul.msk.f32.vlgmr.msrb.gmra.mxu0 %vm743_vm1, %v893_v34 }
 0x237   : > { %1161 = vmatpush.msrb.mxu0 %v740_v9 }
 0x23a   : > { %v890_v35 = vpop.xlane.xlu1 %889 }
 0x23b   : > { %2243 = vrcp.f32 %v890_v35 }
 0x23e   : > { %2157 = vmatmul.msk.f32.vlgmr.msra.gmra.mxu0 %vm743_vm1, %v942_v17 }
 0x241   : > { %v2244_v36 = vpop.eup %2243 }
 0x242   : > { %v894_v37 = vmul.f32 %v2244_v36, %v2240_v27 }
 0x244   : > { %2152 = vmatmul.msk.f32.vlgmr.msra.gmra.mxu1 %vm743_vm1, %v894_v37 }
 0x245   : > { %2161 = vmatpush.xpose.msk.msra.mxu1 %vm743_vm1, %v992_v38 }
 0x246   : > { %2158 = vmatmul.msk.f32.gmra.mxu0 %vm743_vm1, %v944_v18 }
 0x24c   : > { %2160 = vmatmul.msk.f32.vlgmr.msrb.gmra.mxu1 %vm743_vm1, %v966_v39 }
 0x24d   : > { %1192 = vmatpush.msrb.mxu1 %v2508_v4 }
 0x254   : > { %2162 = vmatmul.msk.f32.vlgmr.msra.gmra.mxu1 %vm743_vm1, %v969_v40 }
 0x2b3   : > { %v2560_v41 = vpop.f32.mrf.mxu0 }
 0x2bb   : > { %v1012_v42 = vpop.f32.mrf.mxu0 }
 0x2bc   : > { %1112 = vmatpush.msra.mxu2 %v1012_v42 }
 0x2be   : > { %1215 = vmatpush.msrb.mxu2 %v2504_v2 }
 0x2c1   : > { %v2563_v43 = vpop.f32.mrf.mxu1 }
 0x2c3   : > { %v1015_v44 = vpop.f32.mrf.mxu0 }
 0x2c4   : > { %1135 = vmatpush.msra.mxu3 %v1015_v44  ;;  %v741_v44 = vld [vmem:[%s2448_s16 + $0x10] sm:$0xff] }
 0x2c6   : > { %1238 = vmatpush.msrb.mxu3 %v2536_v16 }
 0x2c9   : > { %v1041_v45 = vpop.f32.mrf.mxu1 }
 0x2ca   : > { %v1070_v46 = vmul.f32 0.17677669, %v1041_v45 }
 0x2cc   : > { %v1072_v47 = vsel %vm743_vm1, %v1070_v46, -inf }
 0x2cd   : > { %1073 = vmax.xlane.f32.xlu0 %v1072_v47 }
 0x2d1   : > { %v1067_v48 = vpop.f32.mrf.mxu1 }
 0x2d2   : > { %v1071_v49 = vmul.f32 0.17677669, %v1067_v48 }
 0x2d4   : > { %v1075_v50 = vsel %vm743_vm1, %v1071_v49, -inf }
 0x2d5   : > { %1076 = vmax.xlane.f32.xlu1 %v1075_v50  ;;  %v739_v50 = vld [vmem:[%s2448_s16] sm:$0xff] }
 0x340   : > { %v1074_v51 = vpop.xlane.xlu0 %1073 }
 0x341   : > { %v1078_v52 = vsub.f32 %v1070_v46, %v1074_v51 }
 0x343   : > { %v1080_v53 = vmul.f32 1.442695, %v1078_v52 }
 0x345   : > { %2245 = vpow2.f32 %v1080_v53 }
 0x348   : > { %v1077_v54 = vpop.xlane.xlu1 %1076 }
 0x349   : > { %v1079_v55 = vsub.f32 %v1071_v49, %v1077_v54 }
 0x34b   : > { %v2246_v56 = vpop.eup %2245  ;;  %v1082_v57 = vmul.f32 1.442695, %v1079_v55 }
 0x34c   : > { %v1084_v58 = vsel %vm743_vm1, %v2246_v56, 0.0 }
 0x34d   : > { %2247 = vpow2.f32 %v1082_v57  ;;  %1085 = vadd.xlane.f32.xlu2 %v1084_v58 }
 0x353   : > { %v2248_v59 = vpop.eup %2247 }
 0x354   : > { %v1087_v60 = vsel %vm743_vm1, %v2248_v59, 0.0 }
 0x355   : > { %1088 = vadd.xlane.f32.xlu1 %v1087_v60 }
 0x365   : > { %1169 = vrot.lane.b32.xlu2 %v2506_v3, %s2324_s24 }
 0x36e   : > { %1171 = vrot.lane.b32.xlu1 %v2516_v5, %s2324_s24 }
 0x3c0   : > { %v1086_v61 = vpop.xlane.xlu2 %1085 }
 0x3c1   : > { %2249 = vrcp.f32 %v1086_v61 }
 0x3c7   : > { %v2250_v62 = vpop.eup %2249 }
 0x3c8   : > { %v1092_v63 = vmul.f32 %v2250_v62, %v2246_v56  ;;  %v1089_v0 = vpop.xlane.xlu1 %1088  ;;  %v1170_v1 = vpop.permute.xlu2 %1169 }
 0x3c9   : > { %2251 = vrcp.f32 %v1089_v0  ;;  %2167 = vmatmul.msk.f32.vlgmr.msrb.gmra.mxu1 %vm743_vm1, %v1170_v1 }
 0x3ca   : > { %2163 = vmatmul.msk.f32.vlgmr.msra.gmra.mxu2 %vm743_vm1, %v1092_v63 }
 0x3cf   : > { %v2252_v6 = vpop.eup %2251 }
 0x3d0   : > { %v1093_v7 = vmul.f32 %v2252_v6, %v2248_v59 }
 0x3d2   : > { %2164 = vmatmul.msk.f32.vlgmr.msra.gmra.mxu3 %vm743_vm1, %v1093_v7  ;;  %2169 = vmatmul.msk.f32.vlgmr.msrb.gmra.mxu2 %vm743_vm1, %v1170_v1 }
 0x3da   : > { %2171 = vmatmul.msk.f32.vlgmr.msrb.gmra.mxu3 %vm743_vm1, %v1170_v1 }
 0x3e0   : > { %v1172_v8 = vpop.permute.xlu1 %1171 }
 0x3e1   : > { %2168 = vmatmul.msk.f32.gmra.mxu1 %vm743_vm1, %v1172_v8  ;;  %2170 = vmatmul.msk.f32.gmra.mxu2 %vm743_vm1, %v1172_v8 }
 0x3e2   : > { %2172 = vmatmul.msk.f32.gmra.mxu3 %vm743_vm1, %v1172_v8 }
 0x446   : > { %v1194_v13 = vpop.f32.mrf.mxu1 }
 0x44d   : > { %v1114_v10 = vpop.f32.mrf.mxu2 }
 0x44e   : > { %2165 = vmatmul.msk.f32.vlgmr.msrb.gmra.mxu0 %vm743_vm1, %v1114_v10 }
 0x455   : > { %v1137_v11 = vpop.f32.mrf.mxu3  ;;  %v1217_v12 = vpop.f32.mrf.mxu2 }
 0x456   : > { %2166 = vmatmul.msk.f32.gmra.mxu0 %vm743_vm1, %v1137_v11 }
 0x457   : > { %2173 = vmatpush.xpose.msk.msra.mxu0 %vm743_vm1, %v1217_v12 }
 0x45b   : > { %1389 = vmatpush.msrb.mxu0 %v741_v44 }
 0x45d   : > { %v1240_v14 = vpop.f32.mrf.mxu3 }
 0x45e   : > { %2174 = vmatmul.msk.f32.vlgmr.msra.gmra.mxu0 %vm743_vm1, %v1194_v13  ;;  %1340 = vmatpush.msra.mxu2 %v1240_v14  ;;  %v1197_v18 = vpop.f32.mrf.mxu1 }
 0x460   : > { %1443 = vmatpush.msrb.mxu2 %v2504_v2 }
 0x464   : > { %v1220_v15 = vpop.f32.mrf.mxu2 }
 0x465   : > { %v1243_v17 = vpop.f32.mrf.mxu3  ;;  %2175 = vmatpush.xpose.msk.msra.mxu1 %vm743_vm1, %v1220_v15 }
 0x466   : > { %1363 = vmatpush.msra.mxu3 %v1243_v17  ;;  %v742_v17 = vld [vmem:[%s2448_s16 + $0x18] sm:$0xff] }
 0x468   : > { %1466 = vmatpush.msrb.mxu3 %v2536_v16  ;;  %2176 = vmatmul.msk.f32.vlgmr.msra.gmra.mxu1 %vm743_vm1, %v1197_v18 }
 0x469   : > { %1420 = vmatpush.msrb.mxu1 %v2508_v4 }
 0x4cb   : > { %v2590_v19 = vpop.f32.mrf.mxu0 }
 0x4d3   : > { %v2592_v20 = vpop.f32.mrf.mxu0 }
 0x4db   : > { %v1269_v21 = vpop.f32.mrf.mxu0 }
 0x4dc   : > { %v1298_v22 = vmul.f32 0.17677669, %v1269_v21 }
 0x4de   : > { %v1300_v2 = vsel %vm743_vm1, %v1298_v22, -inf }
 0x4df   : > { %1301 = vmax.xlane.f32.xlu2 %v1300_v2 }
 0x4e5   : > { %v1295_v23 = vpop.f32.mrf.mxu1 }
 0x4e6   : > { %v1299_v24 = vmul.f32 0.17677669, %v1295_v23 }
 0x4e8   : > { %v1303_v25 = vsel %vm743_vm1, %v1299_v24, -inf }
 0x4e9   : > { %1304 = vmax.xlane.f32.xlu1 %v1303_v25 }
 0x4f7   : > { %1399 = vrot.lane.b32.xlu2 %v2516_v5, %s2325_s0 }
 0x552   : > { %v1302_v4 = vpop.xlane.xlu2 %1301 }
 0x553   : > { %v1306_v16 = vsub.f32 %v1298_v22, %v1302_v4 }
 0x555   : > { %v1308_v26 = vmul.f32 1.442695, %v1306_v16 }
 0x557   : > { %2253 = vpow2.f32 %v1308_v26 }
 0x55a   : > { %v1400_v42 = vpop.permute.xlu2 %1399 }
 0x55c   : > { %v1305_v27 = vpop.xlane.xlu1 %1304 }
 0x55d   : > { %v2254_v28 = vpop.eup %2253  ;;  %v1307_v29 = vsub.f32 %v1299_v24, %v1305_v27  ;;  %v2228_v24 = vld [vmem:[%s2792_s17] ss:$0 sm:$0xff] }
 0x55e   : > { %v1312_v30 = vsel %vm743_vm1, %v2254_v28, 0.0 }
 0x55f   : > { %v1310_v31 = vmul.f32 1.442695, %v1307_v29  ;;  %1313 = vadd.xlane.f32.xlu0 %v1312_v30 }
 0x561   : > { %2255 = vpow2.f32 %v1310_v31 }
 0x567   : > { %v2256_v32 = vpop.eup %2255 }
 0x568   : > { %v1315_v33 = vsel %vm743_vm1, %v2256_v32, 0.0 }
 0x569   : > { %1316 = vadd.xlane.f32.xlu0 %v1315_v33 }
 0x57d   : > { %1397 = vrot.lane.b32.xlu0 %v2506_v3, %s2325_s0 }
 0x5d2   : > { %v1314_v34 = vpop.xlane.xlu0 %1313 }
 0x5d3   : > { %2257 = vrcp.f32 %v1314_v34 }
 0x5d9   : > { %v2258_v35 = vpop.eup %2257 }
 0x5da   : > { %v1320_v36 = vmul.f32 %v2258_v35, %v2254_v28  ;;  %v2326_v35 = vmov 32.0  }
 0x5dc   : > { %2177 = vmatmul.msk.f32.vlgmr.msra.gmra.mxu2 %vm743_vm1, %v1320_v36  ;;  %v1317_v37 = vpop.xlane.xlu0 %1316 }
 0x5dd   : > { %2259 = vrcp.f32 %v1317_v37 }
 0x5e3   : > { %v2260_v38 = vpop.eup %2259 }
 0x5e4   : > { %v1321_v39 = vmul.f32 %v2260_v38, %v2256_v32 }
 0x5e6   : > { %2178 = vmatmul.msk.f32.vlgmr.msra.gmra.mxu3 %vm743_vm1, %v1321_v39 }
 0x5ef   : > { %v1398_v40 = vpop.permute.xlu0 %1397 }
 0x5f0   : > { %2181 = vmatmul.msk.f32.vlgmr.msrb.gmra.mxu1 %vm743_vm1, %v1398_v40  ;;  %2183 = vmatmul.msk.f32.vlgmr.msrb.gmra.mxu2 %vm743_vm1, %v1398_v40 }
 0x5f1   : > { %2185 = vmatmul.msk.f32.vlgmr.msrb.gmra.mxu3 %vm743_vm1, %v1398_v40 }
 0x5f8   : > { %2184 = vmatmul.msk.f32.gmra.mxu2 %vm743_vm1, %v1400_v42  ;;  %2182 = vmatmul.msk.f32.gmra.mxu1 %vm743_vm1, %v1400_v42 }
 0x5f9   : > { %2186 = vmatmul.msk.f32.gmra.mxu3 %vm743_vm1, %v1400_v42 }
 0x65f   : > { %v1342_v45 = vpop.f32.mrf.mxu2 }
 0x660   : > { %2179 = vmatmul.msk.f32.vlgmr.msrb.gmra.mxu0 %vm743_vm1, %v1342_v45 }
 0x669   : > { %v1365_v46 = vpop.f32.mrf.mxu3 }
 0x66a   : > { %2180 = vmatmul.msk.f32.gmra.mxu0 %vm743_vm1, %v1365_v46 }
 0x66d   : > { %v1422_v49 = vpop.f32.mrf.mxu1 }
 0x673   : > { %v1445_v47 = vpop.f32.mrf.mxu2 }
 0x674   : > { %v1468_v48 = vpop.f32.mrf.mxu3  ;;  %2187 = vmatpush.xpose.msk.msra.mxu0 %vm743_vm1, %v1445_v47 }
 0x675   : > { %1568 = vmatpush.msra.mxu2 %v1468_v48  ;;  %v1425_v53 = vpop.f32.mrf.mxu1 }
 0x677   : > { %2188 = vmatmul.msk.f32.vlgmr.msra.gmra.mxu0 %vm743_vm1, %v1422_v49 }
 0x67b   : > { %v1448_v51 = vpop.f32.mrf.mxu2 }
 0x67c   : > { %2189 = vmatpush.xpose.msk.msra.mxu1 %vm743_vm1, %v1448_v51  ;;  %v1471_v52 = vpop.f32.mrf.mxu3 }
 0x67d   : > { %1591 = vmatpush.msrb.mxu0 %v1471_v52 }
 0x67f   : > { %2190 = vmatmul.msk.f32.vlgmr.msra.gmra.mxu1 %vm743_vm1, %v1425_v53  ;;  %1617 = vmatpush.msra.mxu0 %v742_v17  ;;  %v1733_v53 = vld [vmem:[%s2465_s18 + $0x18] sm:$0xff] }
 0x680   : > { %1646 = vmatpush.msrb.mxu1 %v739_v50  ;;  %1756 = vmatpush.msrb.mxu2 %v1733_v53 }
 0x687   : > { %2195 = vmatmul.msk.f32.vlgmr.msrb.gmra.mxu1 %vm743_vm1, %v2560_v41 }
 0x68f   : > { %2196 = vmatmul.msk.f32.gmra.mxu1 %vm743_vm1, %v2563_v43 }
 0x6dd   : > { %v1391_v54 = vpop.f32.mrf.mxu0 }
 0x6e7   : > { %v1394_v55 = vpop.f32.mrf.mxu0 }
 0x6f4   : > { %v1497_v56 = vpop.f32.mrf.mxu0 }
 0x6f5   : > { %v1526_v57 = vmul.f32 0.17677669, %v1497_v56  ;;  %v1730_v56 = vld [vmem:[%s2465_s18] sm:$0xff] }
 0x6f7   : > { %v1528_v58 = vsel %vm743_vm1, %v1526_v57, -inf }
 0x6f8   : > { %1529 = vmax.xlane.f32.xlu0 %v1528_v58 }
 0x6fc   : > { %v1523_v59 = vpop.f32.mrf.mxu1 }
 0x6fd   : > { %v1527_v60 = vmul.f32 0.17677669, %v1523_v59 }
 0x6ff   : > { %v1531_v61 = vsel %vm743_vm1, %v1527_v60, -inf }
 0x700   : > { %1532 = vmax.xlane.f32.xlu1 %v1531_v61  ;;  %v1783_v61 = vld [vmem:[%s2475_s14 + $0x70] sm:$0xff] }
 0x704   : > { %v1648_v22 = vpop.f32.mrf.mxu1 }
 0x705   : > { %v1649_v2 = vadd.f32 %v1648_v22, %v2590_v19  ;;  %v1775_v22 = vld [vmem:[%s2475_s14 + $0x30] sm:$0xff] }
 0x707   : > { %v1654_v23 = vadd.f32 %v1649_v2, %v1391_v54  ;;  %v1732_v54 = vld [vmem:[%s2465_s18 + $0x10] sm:$0xff] }
 0x708   : > { %1757 = vmatpush.msrb.mxu2 %v1732_v54 }
 0x70c   : > { %v1651_v25 = vpop.f32.mrf.mxu1 }
 0x70d   : > { %v1652_v26 = vadd.f32 %v1651_v25, %v2592_v20  ;;  %v2230_v25 = vld [vmem:[%s2795_s26] ss:$0 sm:$0xff] }
 0x70f   : > { %v1655_v30 = vadd.f32 %v1652_v26, %v1394_v55  ;;  %v1731_v55 = vld [vmem:[%s2465_s18 + $0x8] sm:$0xff] }
 0x710   : > { %1758 = vmatpush.msrb.mxu2 %v1731_v55 }
 0x712   : > { %1759 = vmatpush.msrb.mxu2 %v1730_v56 }
 0x76b   : > { %v1530_v62 = vpop.xlane.xlu0 %1529 }
 0x76c   : > { %v1534_v63 = vsub.f32 %v1526_v57, %v1530_v62  ;;  %v1782_v62 = vld [vmem:[%s2475_s14 + $0x68] sm:$0xff] }
 0x76e   : > { %v1536_v0 = vmul.f32 1.442695, %v1534_v63 }
 0x770   : > { %2261 = vpow2.f32 %v1536_v0 }
 0x773   : > { %v1533_v41 = vpop.xlane.xlu1 %1532 }
 0x774   : > { %v1535_v1 = vsub.f32 %v1527_v60, %v1533_v41  ;;  %v1784_v60 = vld [vmem:[%s2475_s14 + $0x78] sm:$0xff]  ;;  %v1781_v41 = vld [vmem:[%s2475_s14 + $0x60] sm:$0xff] }
 0x775   : > { %1789 = vmatpush.msra.mxu3 %v1784_v60 }
 0x776   : > { %v2262_v6 = vpop.eup %2261  ;;  %v1538_v43 = vmul.f32 1.442695, %v1535_v1 }
 0x777   : > { %v1540_v7 = vsel %vm743_vm1, %v2262_v6, 0.0  ;;  %1790 = vmatpush.msra.mxu3 %v1783_v61 }
 0x778   : > { %2263 = vpow2.f32 %v1538_v43  ;;  %1541 = vadd.xlane.f32.xlu1 %v1540_v7  ;;  %v1780_v43 = vld [vmem:[%s2475_s14 + $0x58] sm:$0xff] }
 0x779   : > { %1791 = vmatpush.msra.mxu3 %v1782_v62 }
 0x77b   : > { %1792 = vmatpush.msra.mxu3 %v1781_v41 }
 0x77d   : > { %1793 = vmatpush.msra.mxu3 %v1780_v43 }
 0x77e   : > { %v2264_v8 = vpop.eup %2263 }
 0x77f   : > { %v1543_v9 = vsel %vm743_vm1, %v2264_v8, 0.0 }
 0x780   : > { %1544 = vadd.xlane.f32.xlu2 %v1543_v9 }
 0x7eb   : > { %v1542_v10 = vpop.xlane.xlu1 %1541 }
 0x7ec   : > { %2265 = vrcp.f32 %v1542_v10  ;;  %v1778_v10 = vld [vmem:[%s2475_s14 + $0x48] sm:$0xff] }
 0x7f2   : > { %v2266_v11 = vpop.eup %2265 }
 0x7f3   : > { %v1548_v12 = vmul.f32 %v2266_v11, %v2262_v6  ;;  %v1545_v13 = vpop.xlane.xlu2 %1544 }
 0x7f4   : > { %2267 = vrcp.f32 %v1545_v13 }
 0x7f5   : > { %2191 = vmatmul.msk.f32.vlgmr.msra.gmra.mxu2 %vm743_vm1, %v1548_v12  ;;  %2269 = vrcp.f32 %v2326_v35  ;;  %v1777_v12 = vld [vmem:[%s2475_s14 + $0x40] sm:$0xff]  ;;  %v1771_v35 = vld [vmem:[%s2475_s14 + $0x10] sm:$0xff] }
 0x7fa   : > { %v2268_v14 = vpop.eup %2267 }
 0x7fb   : > { %v1549_v15 = vmul.f32 %v2268_v14, %v2264_v8  ;;  %v2270_v36 = vpop.eup %2269  ;;  %v1779_v8 = vld [vmem:[%s2475_s14 + $0x50] sm:$0xff] }
 0x7fc   : > { %v1676_v20 = vmul.f32 32.0, %v2270_v36  ;;  %vm1680_vm3 = vweird.f32 %v2270_v36  ;;  %1794 = vmatpush.msra.mxu3 %v1779_v8 }
 0x7fd   : > { %2192 = vmatmul.msk.f32.vlgmr.msrb.gmra.mxu0 %vm743_vm1, %v1549_v15  ;;  %v1776_v15 = vld [vmem:[%s2475_s14 + $0x38] sm:$0xff] }
 0x7fe   : > { %v1677_v37 = vsub.f32 1.0, %v1676_v20  ;;  %1795 = vmatpush.msra.mxu3 %v1778_v10  ;;  %v1769_v20 = vld [vmem:[%s2475_s14] sm:$0xff] }
 0x800   : > { %v1678_v38 = vmul.f32 %v2270_v36, %v1677_v37  ;;  %1796 = vmatpush.msra.mxu3 %v1777_v12  ;;  %v2231_v37 = vld [vmem:[%s2797_s1] ss:$0 sm:$0xff] }
 0x802   : > { %v1679_v39 = vadd.f32 %v2270_v36, %v1678_v38  ;;  %1797 = vmatpush.msra.mxu3 %v1776_v15 }
 0x804   : > { %v2640_v40 = vsel %vm1680_vm3, %v2270_v36, %v1679_v39  ;;  %1798 = vmatpush.msra.mxu3 %v1775_v22  ;;  %v1770_v36 = vld [vmem:[%s2475_s14 + $0x8] sm:$0xff] }
 0x878   : > { %v1570_v18 = vpop.f32.mrf.mxu2 }
 0x879   : > { %2193 = vmatmul.msk.f32.vlgmr.msra.gmra.mxu0 %vm743_vm1, %v1570_v18 }
 0x87a   : > { %v1593_v21 = vpop.f32.mrf.mxu0 }
 0x881   : > { %2194 = vmatmul.msk.f32.gmra.mxu0 %vm743_vm1, %v1593_v21  ;;  %v2229_v21 = vld [vmem:[%s2793_s21] ss:$0 sm:$0xff] }
 0x8f6   : > { %v1619_v4 = vpop.f32.mrf.mxu0 }
 0x8f7   : > { %v1656_v16 = vadd.f32 %v1654_v23, %v1619_v4  ;;  %v1774_v4 = vld [vmem:[%s2475_s14 + $0x28] sm:$0xff] }
 0x8f8   : > { %1799 = vmatpush.msra.mxu3 %v1774_v4 }
 0x8f9   : > { %v1662_v27 = vadd.f32 %v2228_v24, %v1656_v16 }
 0x8fb   : > { %v1664_v28 = vadd.f32 %v1662_v27, %v2506_v3  ;;  %v1773_v27 = vld [vmem:[%s2475_s14 + $0x20] sm:$0xff] }
 0x8fc   : > { %1800 = vmatpush.msra.mxu3 %v1773_v27 }
 0x8fd   : > { %v1669_v29 = vsel %vm1668_vm2, %v1664_v28, 0.0 }
 0x8fe   : > { %1670 = vadd.xlane.f32.xlu1 %v1669_v29  ;;  %v1622_v19 = vpop.f32.mrf.mxu0 }
 0x8ff   : > { %v1657_v31 = vadd.f32 %v1655_v30, %v1622_v19  ;;  %v1772_v30 = vld [vmem:[%s2475_s14 + $0x18] sm:$0xff] }
 0x900   : > { %1801 = vmatpush.msra.mxu3 %v1772_v30 }
 0x901   : > { %v1663_v32 = vadd.f32 %v2228_v24, %v1657_v31 }
 0x902   : > { %1802 = vmatpush.msra.mxu3 %v1771_v35 }
 0x903   : > { %v1665_v33 = vadd.f32 %v1663_v32, %v2516_v5 }
 0x904   : > { %1803 = vmatpush.msra.mxu3 %v1770_v36 }
 0x905   : > { %v1672_v34 = vsel %vm1668_vm2, %v1665_v33, 0.0 }
 0x906   : > { %1673 = vadd.xlane.f32.xlu1 %v1672_v34  ;;  %1804 = vmatpush.msra.mxu3 %v1769_v20 }
 0x971   : > { %v1671_v42 = vpop.xlane.xlu1 %1670 }
 0x972   : > { %v1682_v44 = vmul.f32 %v2640_v40, %v1671_v42 }
 0x974   : > { %v1684_v45 = vsub.f32 %v1664_v28, %v1682_v44 }
 0x976   : > { %v1686_v46 = vmul.f32 %v1684_v45, %v1684_v45 }
 0x978   : > { %v1688_v47 = vsel %vm1668_vm2, %v1686_v46, 0.0 }
 0x979   : > { %1689 = vadd.xlane.f32.xlu1 %v1688_v47  ;;  %v1674_v48 = vpop.xlane.xlu1 %1673  ;;  %v2232_v47 = vld [vmem:[%s2798_s28] ss:$0 sm:$0xff] }
 0x97a   : > { %v1683_v49 = vmul.f32 %v2640_v40, %v1674_v48 }
 0x97c   : > { %v2645_v50 = vsub.f32 %v1665_v33, %v1683_v49 }
 0x97e   : > { %v1687_v51 = vmul.f32 %v2645_v50, %v2645_v50 }
 0x980   : > { %v1691_v52 = vsel %vm1668_vm2, %v1687_v51, 0.0 }
 0x981   : > { %1692 = vadd.xlane.f32.xlu0 %v1691_v52 }
 0x9ec   : > { %v1690_v57 = vpop.xlane.xlu1 %1689 }
 0x9ed   : > { %v1694_v58 = vmul.f32 %v1690_v57, %v2640_v40 }
 0x9ef   : > { %v1696_v59 = vadd.f32 1e-05, %v1694_v58 }
 0x9f1   : > { %2271 = vrsqrt.f32 %v1696_v59  ;;  %vm1704_vm5 = vweird.f32 %v1696_v59 }
 0x9f4   : > { %v1693_v63 = vpop.xlane.xlu0 %1692 }
 0x9f5   : > { %v1695_v0 = vmul.f32 %v1693_v63, %v2640_v40 }
 0x9f7   : > { %v2272_v1 = vpop.eup %2271  ;;  %v1697_v6 = vadd.f32 1e-05, %v1695_v0 }
 0x9f8   : > { %v1699_v7 = vmul.f32 %v2272_v1, %v1696_v59  ;;  %vm1705_vm4 = vweird.f32 %v2272_v1 }
 0x9f9   : > { %2273 = vrsqrt.f32 %v1697_v6  ;;  %vm1706_vm6 = vmor %vm1704_vm5, %vm1705_vm4  ;;  %vm1714_vm8 = vweird.f32 %v1697_v6 }
 0x9fa   : > { %v1700_v9 = vmul.f32 %v2272_v1, %v1699_v7 }
 0x9fc   : > { %v1701_v11 = vmul.f32 0.5, %v1700_v9 }
 0x9fe   : > { %v1702_v13 = vsub.f32 1.5, %v1701_v11 }
 0x9ff   : > { %v2274_v14 = vpop.eup %2273 }
 0xa00   : > { %v1703_v17 = vmul.f32 %v2272_v1, %v1702_v13  ;;  %v1709_v18 = vmul.f32 %v2274_v14, %v1697_v6  ;;  %vm1715_vm7 = vweird.f32 %v2274_v14 }
 0xa01   : > { %vm1716_vm9 = vmor %vm1714_vm8, %vm1715_vm7 }
 0xa02   : > { %v1707_v2 = vsel %vm1706_vm6, %v2272_v1, %v1703_v17  ;;  %v1710_v23 = vmul.f32 %v2274_v14, %v1709_v18 }
 0xa03   : > { %v1718_v24 = vmul.f32 %v1707_v2, %v1684_v45 }
 0xa04   : > { %v1711_v16 = vmul.f32 0.5, %v1710_v23 }
 0xa05   : > { %v1723_v26 = vmul.f32 %v2229_v21, %v1718_v24  ;;  %v2234_v24 = vld [vmem:[%s718_s8] ss:$0 sm:$0xff] }
 0xa06   : > { %v1712_v28 = vsub.f32 1.5, %v1711_v16 }
 0xa07   : > { %v1728_v29 = vadd.f32 %v2230_v25, %v1723_v26 }
 0xa08   : > { %v1713_v19 = vmul.f32 %v2274_v14, %v1712_v28 }
 0xa09   : > { %2197 = vmatmul.msk.f32.vlgmr.msrb.gmra.mxu2 %vm1668_vm2, %v1728_v29 }
 0xa0a   : > { %v1717_v31 = vsel %vm1716_vm9, %v2274_v14, %v1713_v19 }
 0xa0b   : > { %v1719_v32 = vmul.f32 %v1717_v31, %v2645_v50 }
 0xa0d   : > { %v1724_v33 = vmul.f32 %v2229_v21, %v1719_v32  ;;  %v2233_v21 = vld [vmem:[%s715_s2] ss:$0 sm:$0xff] }
 0xa0f   : > { %v1729_v34 = vadd.f32 %v2230_v25, %v1724_v33 }
 0xa11   : > { %2198 = vmatmul.msk.f32.gmra.mxu2 %vm1668_vm2, %v1729_v34 }
 0xa8c   : > { %v1761_v38 = vpop.f32.mrf.mxu2 }
 0xa8d   : > { %v1762_v39 = vadd.f32 %v2231_v37, %v1761_v38 }
 0xa8f   : > { %v1767_v42 = vmax.f32 %v1762_v39, 0.0 }
 0xa91   : > { %1805 = vmatmul.f32.vlgmr.msra.gmra.mxu3 %v1767_v42 }
 0xa94   : > { %v1764_v44 = vpop.f32.mrf.mxu2 }
 0xa95   : > { %v1765_v45 = vadd.f32 %v2231_v37, %v1764_v44 }
 0xa97   : > { %v1768_v46 = vmax.f32 %v1765_v45, 0.0 }
 0xa99   : > { %1808 = vmatmul.f32.gmra.mxu3 %v1768_v46 }
 0xb14   : > { %v1806_v48 = vpop.f32.mrf.mxu3 }
 0xb15   : > { %v1807_v49 = vadd.f32 %v2232_v47, %v1806_v48 }
 0xb17   : > { %v1812_v50 = vadd.f32 %v1807_v49, %v1728_v29 }
 0xb19   : > { %v1816_v51 = vsel %vm1668_vm2, %v1812_v50, 0.0 }
 0xb1a   : > { %1817 = vadd.xlane.f32.xlu1 %v1816_v51 }
 0xb1c   : > { %v1809_v52 = vpop.f32.mrf.mxu3 }
 0xb1d   : > { %v1810_v53 = vadd.f32 %v2232_v47, %v1809_v52 }
 0xb1f   : > { %v1813_v54 = vadd.f32 %v1810_v53, %v1729_v34 }
 0xb21   : > { %v1819_v55 = vsel %vm1668_vm2, %v1813_v54, 0.0 }
 0xb22   : > { %1820 = vadd.xlane.f32.xlu0 %v1819_v55 }
 0xb8d   : > { %v1818_v56 = vpop.xlane.xlu1 %1817 }
 0xb8e   : > { %v1822_v57 = vmul.f32 %v1818_v56, %v2640_v40 }
 0xb90   : > { %v1824_v58 = vsub.f32 %v1812_v50, %v1822_v57 }
 0xb92   : > { %v1826_v59 = vmul.f32 %v1824_v58, %v1824_v58 }
 0xb94   : > { %v1828_v60 = vsel %vm1668_vm2, %v1826_v59, 0.0  ;;  %v2235_v59 = vld [vmem:[%s721_s9] ss:$0 sm:$0xff]  ;;  %s2802_s9 = sld [smem:[#allocation7_spill]] }
 0xb95   : > { %v1821_v61 = vpop.xlane.xlu0 %1820  ;;  %1829 = vadd.xlane.f32.xlu1 %v1828_v60 }
 0xb96   : > { %v1823_v62 = vmul.f32 %v1821_v61, %v2640_v40  ;;  %v2236_v61 = vld [vmem:[%s724_s22] ss:$0 sm:$0xff] }
 0xb98   : > { %v1825_v63 = vsub.f32 %v1813_v54, %v1823_v62 }
 0xb9a   : > { %v1827_v0 = vmul.f32 %v1825_v63, %v1825_v63  ;;  %p2199_p5 = scmp.ne.s32.totalorder %s2802_s9, 1 }
 0xb9c   : > { %v1831_v41 = vsel %vm1668_vm2, %v1827_v0, 0.0 }
 0xb9d   : > { %1832 = vadd.xlane.f32.xlu0 %v1831_v41 }
 0xc08   : > { %v1830_v1 = vpop.xlane.xlu1 %1829 }
 0xc09   : > { %v1834_v6 = vmul.f32 %v1830_v1, %v2640_v40 }
 0xc0b   : > { %v1836_v43 = vadd.f32 1e-05, %v1834_v6 }
 0xc0d   : > { %2275 = vrsqrt.f32 %v1836_v43  ;;  %vm1844_vm11 = vweird.f32 %v1836_v43 }
 0xc10   : > { %v1833_v7 = vpop.xlane.xlu0 %1832 }
 0xc11   : > { %v1835_v8 = vmul.f32 %v1833_v7, %v2640_v40 }
 0xc13   : > { %v2276_v9 = vpop.eup %2275  ;;  %v1837_v10 = vadd.f32 1e-05, %v1835_v8 }
 0xc14   : > { %v1839_v11 = vmul.f32 %v2276_v9, %v1836_v43  ;;  %vm1845_vm10 = vweird.f32 %v2276_v9 }
 0xc15   : > { %2277 = vrsqrt.f32 %v1837_v10  ;;  %vm1846_vm12 = vmor %vm1844_vm11, %vm1845_vm10  ;;  %vm1854_vm14 = vweird.f32 %v1837_v10 }
 0xc16   : > { %v1840_v12 = vmul.f32 %v2276_v9, %v1839_v11 }
 0xc18   : > { %v1841_v13 = vmul.f32 0.5, %v1840_v12 }
 0xc1a   : > { %v1842_v14 = vsub.f32 1.5, %v1841_v13 }
 0xc1b   : > { %v2278_v15 = vpop.eup %2277 }
 0xc1c   : > { %v1843_v17 = vmul.f32 %v2276_v9, %v1842_v14  ;;  %v1849_v18 = vmul.f32 %v2278_v15, %v1837_v10  ;;  %vm1855_vm13 = vweird.f32 %v2278_v15 }
 0xc1d   : > { %vm1856_vm15 = vmor %vm1854_vm14, %vm1855_vm13 }
 0xc1e   : > { %v1847_v22 = vsel %vm1846_vm12, %v2276_v9, %v1843_v17  ;;  %v1850_v2 = vmul.f32 %v2278_v15, %v1849_v18 }
 0xc1f   : > { %v1858_v23 = vmul.f32 %v1847_v22, %v1824_v58 }
 0xc20   : > { %v1851_v25 = vmul.f32 0.5, %v1850_v2 }
 0xc21   : > { %v1863_v4 = vmul.f32 %v2233_v21, %v1858_v23 }
 0xc22   : > { %v1852_v16 = vsub.f32 1.5, %v1851_v25 }
 0xc23   : > { %v1868_v26 = vadd.f32 %v2234_v24, %v1863_v4 }
 0xc24   : > { %v1853_v27 = vmul.f32 %v2278_v15, %v1852_v16 }
 0xc25   : > { %v1870_v28 = vadd.f32 %v1868_v26, %v2506_v3 }
 0xc26   : > { %v1857_v29 = vsel %vm1856_vm15, %v2278_v15, %v1853_v27 }
 0xc27   : > { %v1874_v30 = vsel %vm1668_vm2, %v1870_v28, 0.0  ;;  %v1859_v19 = vmul.f32 %v1857_v29, %v1825_v63 }
 0xc28   : > { %1875 = vadd.xlane.f32.xlu2 %v1874_v30 }
 0xc29   : > { %v1864_v31 = vmul.f32 %v2233_v21, %v1859_v19 }
 0xc2b   : > { %v1869_v32 = vadd.f32 %v2234_v24, %v1864_v31 }
 0xc2d   : > { %v1871_v33 = vadd.f32 %v1869_v32, %v2516_v5 }
 0xc2f   : > { %v1877_v34 = vsel %vm1668_vm2, %v1871_v33, 0.0 }
 0xc30   : > { %1878 = vadd.xlane.f32.xlu1 %v1877_v34 }
 0xc9b   : > { %v1876_v35 = vpop.xlane.xlu2 %1875 }
 0xc9c   : > { %v1880_v36 = vmul.f32 %v1876_v35, %v2640_v40 }
 0xc9e   : > { %v1882_v20 = vsub.f32 %v1870_v28, %v1880_v36 }
 0xca0   : > { %v1884_v37 = vmul.f32 %v1882_v20, %v1882_v20 }
 0xca2   : > { %v1886_v38 = vsel %vm1668_vm2, %v1884_v37, 0.0 }
 0xca3   : > { %1887 = vadd.xlane.f32.xlu0 %v1886_v38  ;;  %v1879_v3 = vpop.xlane.xlu1 %1878 }
 0xca4   : > { %v1881_v39 = vmul.f32 %v1879_v3, %v2640_v40 }
 0xca6   : > { %v1883_v42 = vsub.f32 %v1871_v33, %v1881_v39 }
 0xca8   : > { %v1885_v44 = vmul.f32 %v1883_v42, %v1883_v42 }
 0xcaa   : > { %v1889_v45 = vsel %vm1668_vm2, %v1885_v44, 0.0 }
 0xcab   : > { %1890 = vadd.xlane.f32.xlu2 %v1889_v45 }
 0xd16   : > { %v1888_v5 = vpop.xlane.xlu0 %1887 }
 0xd17   : > { %v1892_v46 = vmul.f32 %v1888_v5, %v2640_v40 }
 0xd19   : > { %v1894_v47 = vadd.f32 1e-05, %v1892_v46 }
 0xd1b   : > { %2279 = vrsqrt.f32 %v1894_v47  ;;  %vm1902_vm1 = vweird.f32 %v1894_v47 }
 0xd1e   : > { %v1891_v48 = vpop.xlane.xlu2 %1890 }
 0xd1f   : > { %v1893_v49 = vmul.f32 %v1891_v48, %v2640_v40 }
 0xd21   : > { %v2280_v50 = vpop.eup %2279  ;;  %v1895_v51 = vadd.f32 1e-05, %v1893_v49 }
 0xd22   : > { %v1897_v52 = vmul.f32 %v2280_v50, %v1894_v47  ;;  %vm1903_vm0 = vweird.f32 %v2280_v50 }
 0xd23   : > { %2281 = vrsqrt.f32 %v1895_v51  ;;  %vm1904_vm3 = vmor %vm1902_vm1, %vm1903_vm0  ;;  %vm1912_vm5 = vweird.f32 %v1895_v51 }
 0xd24   : > { %v1898_v53 = vmul.f32 %v2280_v50, %v1897_v52 }
 0xd26   : > { %v1899_v54 = vmul.f32 0.5, %v1898_v53 }
 0xd28   : > { %v1900_v55 = vsub.f32 1.5, %v1899_v54 }
 0xd29   : > { %v2282_v56 = vpop.eup %2281 }
 0xd2a   : > { %v1901_v57 = vmul.f32 %v2280_v50, %v1900_v55  ;;  %v1907_v58 = vmul.f32 %v2282_v56, %v1895_v51  ;;  %vm1913_vm4 = vweird.f32 %v2282_v56 }
 0xd2b   : > { %vm1914_vm6 = vmor %vm1912_vm5, %vm1913_vm4 }
 0xd2c   : > { %v1905_v40 = vsel %vm1904_vm3, %v2280_v50, %v1901_v57  ;;  %v1908_v60 = vmul.f32 %v2282_v56, %v1907_v58 }
 0xd2d   : > { %v1916_v62 = vmul.f32 %v1905_v40, %v1882_v20 }
 0xd2e   : > { %v1909_v63 = vmul.f32 0.5, %v1908_v60 }
 0xd2f   : > { %v1921_v0 = vmul.f32 %v2235_v59, %v1916_v62 }
 0xd30   : > { %v1910_v41 = vsub.f32 1.5, %v1909_v63 }
 0xd31   : > { %v1926_v1 = vadd.f32 %v2236_v61, %v1921_v0 }
 0xd32   : > { %v1911_v6 = vmul.f32 %v2282_v56, %v1910_v41 }
 0xd33   : > { %1928 = vst.msk [vmem:[#allocation2] sm:$0xff] %vm1668_vm2, %v1926_v1 }
 0xd34   : > { %v1915_v43 = vsel %vm1914_vm6, %v2282_v56, %v1911_v6 }
 0xd35   : > { %v1917_v7 = vmul.f32 %v1915_v43, %v1883_v42 }
 0xd37   : > { %v1922_v8 = vmul.f32 %v2235_v59, %v1917_v7  ;;  %1933 = sbr.rel (%p2199_p5) target bundleno = 3390 (0xd3e), region = 92 }
 0xd39   : > { %v1927_v9 = vadd.f32 %v2236_v61, %v1922_v8 }
 0xd3b   : > { %1929 = vst.msk [vmem:[#allocation2 + $0x8] sm:$0xff] %vm1668_vm2, %v1927_v9 }
 0xd3c   : > { %1934 = vst.msk [vmem:[#allocation3] sm:$0xff] %vm1668_vm2, %v1926_v1 }
 0xd3d   : > { %1935 = vst.msk [vmem:[#allocation3 + $0x8] sm:$0xff] %vm1668_vm2, %v1927_v9 }
 0xd3e PF: > { %s2803_s23 = sld [smem:[#allocation7_spill]]  ;;  %s2327_s22 = smov [#allocation3]  }
 0xd3f   : > { %s1941_s20 = sshll.u32 %s2327_s22, 4  ;;  %s2804_s26 = sld [smem:[#allocation19_spill]]  ;;  %s1942_s20 = int_to_ptr.vmem [resolvable:$true] %s1941_s20 }
 0xd40   : > { %s2328_s30 = smov 128   ;;  %s2329_s29 = smov 8  }
 0xd44   : > { %p2211_p6 = scmp.eq.s32.totalorder %s2803_s23, 1 }
 0xd45   : > { %s1943_s27 = sshll.u32 %s2804_s26, 4  ;;  %s1944_s27 = int_to_ptr.hbm [resolvable:$true] %s1943_s27 }
 0xd46   : > { %2208 = dma.vmem_to_hbm [thread:$0]  (%p2211_p6), %s1942_s20, 256, %s1944_s27, [#allocation4], %s2328_s30, %s2328_s30, %s2329_s29  }
 0xd47   : > { %2316 = dma.done.wait (%p2211_p6), [#allocation4], 256  }
 0xd48   : > { %2318 = vsyncadd (%p2211_p6), [#allocation4], 4294967040 }
 0xd49 PF: > { %s2805_s1 = sld [smem:[#allocation6_spill]] }
 0xd4f   : > { %s27_s21 = sadd.s32 1, %s2805_s1  }
 0xd50   : > { %p24_p7 = scmp.ge.s32.totalorder %s27_s21, 4  }
 0xd52   :  { %26 = sbr.rel (!%p24_p7) target bundleno = 14 (0xe), region = 161 }
 0xd57   :  { %1960 = vsyncpa [#allocation4], 1 }
 0xd58   :  { %1962 = vsyncpa [#allocation4 + $0x1], 1 }

</bundles_post_ra>
